<compile_context>
chip_gen: v6e
topology: v6e:2x2x1
jax: 0.10.0
libtpu: 0.0.40
codegen_flags: <defaults>
</compile_context>

<pallas_src>
import jax
import jax.numpy as jnp
from jax.experimental import pallas as pl
from jax.experimental.pallas import tpu as pltpu  # noqa: F401  (kept for scale-up TODOs)

# ---------------- model config (small synthetic stand-in for ViT-B-16) ----------------
B = 2                      # batch
C = 3                      # image channels
IMG = 16                   # image height = width
PATCH = 8                  # patch size
P = (IMG // PATCH) ** 2    # number of patches (4)
N = P + 1                  # tokens incl. CLS (5)
D = 32                     # transformer width
HEADS = 4
HD = D // HEADS            # head dim (8)
MLP = 4 * D                # MLP hidden (128)
LAYERS = 2
EMB = 32                   # output embedding dim (image projection)
NUM_CLASSES = 16           # zero-shot classifier classes
CLS_PAD = 128              # lane-dense padded classifier width
PATCH_DIM = C * PATCH * PATCH  # 192
EPS = 1e-5
NEG_INF = -1e9             # additive mask for cross-batch attention entries


# --------------------------------- kernel math helpers ---------------------------------
def _ln_fast(x, w, b):
    # two independent lane reductions; mu/var via E[x^2]-E[x]^2 (shorter dep chain)
    inv_d = 1.0 / x.shape[-1]
    s1 = jnp.sum(x, axis=-1, keepdims=True)
    s2 = jnp.sum(x * x, axis=-1, keepdims=True)
    mu = s1 * inv_d
    var = s2 * inv_d - mu * mu
    return (x - mu) * jax.lax.rsqrt(var + EPS) * w + b


# ------------------------------------ fused kernel -------------------------------------
def fused_clip_kernel(patch_ref, const_ref, bias_ref, wp_ref,
                      lnpre_w_ref, lnpre_b_ref,
                      ln1w_ref, ln1b_ref, wqkv_ref, bqkv_ref, wo_ref, bo_ref,
                      ln2w_ref, ln2b_ref, w1_ref, b1_ref, w2_ref, b2_ref,
                      lnpost_w_ref, lnpost_b_ref, proj_ref, clsw_ref,
                      o_ref):
    # ---- patch embedding + token assembly in one shot ----
    # patch_ref has a zero row at every CLS position, so the dot covers CLS rows too;
    # const_ref carries pos_emb (+ cls_emb at CLS rows, + patch bias at patch rows).
    x = jnp.dot(patch_ref[...], wp_ref[...],
                preferred_element_type=jnp.float32) + const_ref[...]       # [B*N, D]
    x = _ln_fast(x, lnpre_w_ref[...], lnpre_b_ref[...])

    bias = bias_ref[...]                                                   # [B*N, B*N]

    # ---- transformer blocks (small static trip-count: fully unrolled) ----
    for l in range(LAYERS):
        # --- multi-head self-attention (1/sqrt(HD) already folded into q weights) ---
        h = _ln_fast(x, ln1w_ref[l], ln1b_ref[l])
        qkv = jnp.dot(h, wqkv_ref[l],
                      preferred_element_type=jnp.float32) + bqkv_ref[l]    # [B*N, 3D]
        head_outs = []
        # TODO(synk): at real HD=64 batch the per-head dots over heads (dot_general with
        # a head batch dim) instead of this unrolled per-head loop.
        for hi in range(HEADS):
            q = qkv[:, hi * HD:(hi + 1) * HD]
            k = qkv[:, D + hi * HD:D + (hi + 1) * HD]
            v = qkv[:, 2 * D + hi * HD:2 * D + (hi + 1) * HD]
            # whole-batch score matrix; block-diagonal bias kills cross-batch attention
            s = jnp.dot(q, k.T, preferred_element_type=jnp.float32) + bias
            s = s - jnp.max(s, axis=-1, keepdims=True)
            p = jnp.exp(s)
            p = p * pl.reciprocal(jnp.sum(p, axis=-1, keepdims=True), approx=True)
            head_outs.append(jnp.dot(p, v, preferred_element_type=jnp.float32))
        attn = jnp.concatenate(head_outs, axis=-1)                         # [B*N, D]
        x = x + jnp.dot(attn, wo_ref[l],
                        preferred_element_type=jnp.float32) + bo_ref[l]

        # --- MLP ---
        h2 = _ln_fast(x, ln2w_ref[l], ln2b_ref[l])
        h2 = jnp.dot(h2, w1_ref[l], preferred_element_type=jnp.float32) + b1_ref[l]
        h2 = jax.nn.gelu(h2, approximate=True)
        h2 = jnp.dot(h2, w2_ref[l], preferred_element_type=jnp.float32) + b2_ref[l]
        x = x + h2

    # ---- head: ln_post(CLS) -> projection -> L2 normalize -> 100 * emb @ zero-shot W ----
    # TODO(synk): with a per-batch grid (v7x plan) the CLS gather becomes row 0 of the block.
    cls_tok = jnp.concatenate([x[b * N:b * N + 1, :] for b in range(B)], axis=0)  # [B, D]
    e = _ln_fast(cls_tok, lnpost_w_ref[...], lnpost_b_ref[...])
    emb = jnp.dot(e, proj_ref[...], preferred_element_type=jnp.float32)    # [B, EMB]
    emb = emb * jax.lax.rsqrt(jnp.sum(emb * emb, axis=-1, keepdims=True) + 1e-12)
    o_ref[...] = 100.0 * jnp.dot(emb, clsw_ref[...],
                                 preferred_element_type=jnp.float32)       # [B, CLS_PAD]


# ------------------------------------ forward (glue) -----------------------------------
def forward(img, params):
    # unfold NCHW image into conv-as-matmul patches: [B, P, C*p*p]
    patches = img.reshape(B, C, IMG // PATCH, PATCH, IMG // PATCH, PATCH)
    patches = patches.transpose(0, 2, 4, 1, 3, 5).reshape(B, P, PATCH_DIM)
    # zero row at each CLS position so one matmul covers all B*N token rows
    patches_padded = jnp.pad(patches, ((0, 0), (1, 0), (0, 0))).reshape(B * N, PATCH_DIM)

    # per-token additive constant: pos emb + (cls emb at CLS rows | patch bias elsewhere)
    is_cls = (jnp.arange(B * N) % N == 0)[:, None]
    tok_const = (jnp.tile(params["pos_emb"], (B, 1))
                 + jnp.where(is_cls, params["cls_emb"], params["b_patch"])).astype(jnp.float32)

    # block-diagonal additive bias so whole-batch attention never mixes batch elements
    rows = jnp.arange(B * N) // N
    attn_bias = jnp.where(rows[:, None] == rows[None, :], 0.0, NEG_INF).astype(jnp.float32)

    # fold the 1/sqrt(HD) attention scale into the q columns of wqkv / bqkv
    scale = 1.0 / (HD ** 0.5)
    wqkv_s = params["wqkv"].at[:, :, :D].multiply(scale)
    bqkv_s = params["bqkv"].at[:, :, :D].multiply(scale)

    logits_pad = pl.pallas_call(
        fused_clip_kernel,
        out_shape=jax.ShapeDtypeStruct((B, CLS_PAD), jnp.float32),
    )(patches_padded, tok_const, attn_bias, params["w_patch"],
      params["ln_pre_w"], params["ln_pre_b"],
      params["ln1_w"], params["ln1_b"], wqkv_s, bqkv_s,
      params["wo"], params["bo"], params["ln2_w"], params["ln2_b"],
      params["w1"], params["b1"], params["w2"], params["b2"],
      params["ln_post_w"], params["ln_post_b"], params["proj"], params["clsw_pad"])

    return logits_pad[:, :NUM_CLASSES]


# ------------------------------- pure-JAX reference check ------------------------------
def _ln_ref(x, w, b):
    mu = jnp.mean(x, axis=-1, keepdims=True)
    var = jnp.mean((x - mu) ** 2, axis=-1, keepdims=True)
    return (x - mu) * jax.lax.rsqrt(var + EPS) * w + b


def reference_forward(img, params):
    x = img.reshape(B, C, IMG // PATCH, PATCH, IMG // PATCH, PATCH)
    x = x.transpose(0, 2, 4, 1, 3, 5).reshape(B, P, PATCH_DIM)
    tok = x @ params["w_patch"] + params["b_patch"]
    cls = jnp.broadcast_to(params["cls_emb"].reshape(1, 1, D), (B, 1, D))
    tok = jnp.concatenate([cls, tok], axis=1) + params["pos_emb"][None]
    tok = _ln_ref(tok, params["ln_pre_w"], params["ln_pre_b"])
    for l in range(LAYERS):
        h = _ln_ref(tok, params["ln1_w"][l], params["ln1_b"][l])
        qkv = h @ params["wqkv"][l] + params["bqkv"][l]
        q, k, v = jnp.split(qkv, 3, axis=-1)
        q = q.reshape(B, N, HEADS, HD)
        k = k.reshape(B, N, HEADS, HD)
        v = v.reshape(B, N, HEADS, HD)
        s = jnp.einsum("bnhd,bmhd->bhnm", q, k) * (1.0 / (HD ** 0.5))
        p = jax.nn.softmax(s, axis=-1)
        o = jnp.einsum("bhnm,bmhd->bnhd", p, v).reshape(B, N, D)
        tok = tok + o @ params["wo"][l] + params["bo"][l]
        h2 = _ln_ref(tok, params["ln2_w"][l], params["ln2_b"][l])
        h2 = jax.nn.gelu(h2 @ params["w1"][l] + params["b1"][l], approximate=True)
        tok = tok + h2 @ params["w2"][l] + params["b2"][l]
    emb = _ln_ref(tok[:, 0, :], params["ln_post_w"], params["ln_post_b"]) @ params["proj"]
    emb = emb / jnp.linalg.norm(emb, axis=-1, keepdims=True)
    return 100.0 * emb @ params["clsw"]


# ---------------------------------- deterministic init ---------------------------------
def init_params(key):
    kit = iter(jax.random.split(key, 64))

    def nrm(shape, scale=0.02):
        return scale * jax.random.normal(next(kit), shape, jnp.float32)

    def stack(fn):
        return jnp.stack([fn() for _ in range(LAYERS)], axis=0)

    ones = lambda s: jnp.ones(s, jnp.float32)
    zeros = lambda s: jnp.zeros(s, jnp.float32)

    params = dict(
        w_patch=nrm((PATCH_DIM, D)), b_patch=zeros((1, D)),
        cls_emb=nrm((1, D), 1.0), pos_emb=nrm((N, D), 0.01),
        ln_pre_w=ones((1, D)), ln_pre_b=zeros((1, D)),
        # per-layer weights stacked on a leading LAYERS axis (indexed inside the kernel)
        ln1_w=ones((LAYERS, 1, D)), ln1_b=zeros((LAYERS, 1, D)),
        wqkv=stack(lambda: nrm((D, 3 * D))), bqkv=zeros((LAYERS, 1, 3 * D)),
        wo=stack(lambda: nrm((D, D))), bo=zeros((LAYERS, 1, D)),
        ln2_w=ones((LAYERS, 1, D)), ln2_b=zeros((LAYERS, 1, D)),
        w1=stack(lambda: nrm((D, MLP))), b1=zeros((LAYERS, 1, MLP)),
        w2=stack(lambda: nrm((MLP, D))), b2=zeros((LAYERS, 1, D)),
        ln_post_w=ones((1, D)), ln_post_b=zeros((1, D)),
        proj=nrm((D, EMB)),
    )
    clsw = nrm((EMB, NUM_CLASSES), 1.0)
    clsw = clsw / jnp.linalg.norm(clsw, axis=0, keepdims=True)  # unit-norm "text" embeddings
    params["clsw"] = clsw
    # zero-pad classifier columns to 128 so the kernel's output store is lane-dense
    params["clsw_pad"] = jnp.pad(clsw, ((0, 0), (0, CLS_PAD - NUM_CLASSES)))
    return params


# ---------------------------------------- main ------------------------------------------
if __name__ == "__main__":
    key = jax.random.PRNGKey(0)
    pkey, xkey = jax.random.split(key)
    params = init_params(pkey)
    img = jax.random.normal(xkey, (B, C, IMG, IMG), dtype=jnp.float32)

    logits = jax.jit(forward)(img, params)
    logits = jax.block_until_ready(logits)

    assert logits.shape == (B, NUM_CLASSES) and logits.dtype == jnp.float32
    ref = reference_forward(img, params)
    assert jnp.allclose(logits, ref, atol=5e-3, rtol=5e-3), "mismatch vs pure-JAX reference"

    print("KERNEL_OK")
</pallas_src>

<mosaic_0001>
module attributes {stable_mosaic.version = 11 : i64} {
  func.func @fused_clip_kernel(%arg0: memref<10x192xf32, #tpu.memory_space<vmem>>, %arg1: memref<10x32xf32, #tpu.memory_space<vmem>>, %arg2: memref<10x10xf32, #tpu.memory_space<vmem>>, %arg3: memref<192x32xf32, #tpu.memory_space<vmem>>, %arg4: memref<1x32xf32, #tpu.memory_space<vmem>>, %arg5: memref<1x32xf32, #tpu.memory_space<vmem>>, %arg6: memref<2x1x32xf32, #tpu.memory_space<vmem>>, %arg7: memref<2x1x32xf32, #tpu.memory_space<vmem>>, %arg8: memref<2x32x96xf32, #tpu.memory_space<vmem>>, %arg9: memref<2x1x96xf32, #tpu.memory_space<vmem>>, %arg10: memref<2x32x32xf32, #tpu.memory_space<vmem>>, %arg11: memref<2x1x32xf32, #tpu.memory_space<vmem>>, %arg12: memref<2x1x32xf32, #tpu.memory_space<vmem>>, %arg13: memref<2x1x32xf32, #tpu.memory_space<vmem>>, %arg14: memref<2x32x128xf32, #tpu.memory_space<vmem>>, %arg15: memref<2x1x128xf32, #tpu.memory_space<vmem>>, %arg16: memref<2x128x32xf32, #tpu.memory_space<vmem>>, %arg17: memref<2x1x32xf32, #tpu.memory_space<vmem>>, %arg18: memref<1x32xf32, #tpu.memory_space<vmem>>, %arg19: memref<1x32xf32, #tpu.memory_space<vmem>>, %arg20: memref<32x32xf32, #tpu.memory_space<vmem>>, %arg21: memref<32x128xf32, #tpu.memory_space<vmem>>, %arg22: memref<2x128xf32, #tpu.memory_space<vmem>>) attributes {dimension_semantics = [], scalar_prefetch = 0 : i64, scratch_operands = 0 : i64, tpu.core_type = #tpu.core_type<tc>} {
    %c0 = arith.constant 0 : index
    %c0_0 = arith.constant 0 : index
    %0 = vector.load %arg0[%c0, %c0_0] : memref<10x192xf32, #tpu.memory_space<vmem>>, vector<10x192xf32>
    %c0_1 = arith.constant 0 : index
    %c0_2 = arith.constant 0 : index
    %1 = vector.load %arg3[%c0_1, %c0_2] : memref<192x32xf32, #tpu.memory_space<vmem>>, vector<192x32xf32>
    %cst = arith.constant dense<0.000000e+00> : vector<10x32xf32>
    %2 = tpu.matmul %0, %1, %cst {dimension_numbers = #tpu.dot_dimension_numbers<[1], [0], [0], [1], [0, 0, 1, 1], [], []>} : vector<10x192xf32>, vector<192x32xf32>, vector<10x32xf32> -> vector<10x32xf32>
    %c0_3 = arith.constant 0 : index
    %c0_4 = arith.constant 0 : index
    %3 = vector.load %arg1[%c0_3, %c0_4] : memref<10x32xf32, #tpu.memory_space<vmem>>, vector<10x32xf32>
    %4 = arith.addf %2, %3 : vector<10x32xf32>
    %c0_5 = arith.constant 0 : index
    %c0_6 = arith.constant 0 : index
    %5 = vector.load %arg4[%c0_5, %c0_6] : memref<1x32xf32, #tpu.memory_space<vmem>>, vector<1x32xf32>
    %c0_7 = arith.constant 0 : index
    %c0_8 = arith.constant 0 : index
    %6 = vector.load %arg5[%c0_7, %c0_8] : memref<1x32xf32, #tpu.memory_space<vmem>>, vector<1x32xf32>
    %cst_9 = arith.constant dense<0.000000e+00> : vector<10xf32>
    %7 = vector.multi_reduction <add>, %4, %cst_9 [1] : vector<10x32xf32> to vector<10xf32>
    %8 = vector.shape_cast %7 : vector<10xf32> to vector<10x1xf32>
    %9 = arith.mulf %4, %4 : vector<10x32xf32>
    %cst_10 = arith.constant dense<0.000000e+00> : vector<10xf32>
    %10 = vector.multi_reduction <add>, %9, %cst_10 [1] : vector<10x32xf32> to vector<10xf32>
    %11 = vector.shape_cast %10 : vector<10xf32> to vector<10x1xf32>
    %cst_11 = arith.constant 3.125000e-02 : f32
    %12 = vector.broadcast %cst_11 : f32 to vector<10x1xf32>
    %13 = arith.mulf %8, %12 : vector<10x1xf32>
    %cst_12 = arith.constant 3.125000e-02 : f32
    %14 = vector.broadcast %cst_12 : f32 to vector<10x1xf32>
    %15 = arith.mulf %11, %14 : vector<10x1xf32>
    %16 = arith.mulf %13, %13 : vector<10x1xf32>
    %17 = arith.subf %15, %16 : vector<10x1xf32>
    %18 = vector.broadcast %13 : vector<10x1xf32> to vector<10x32xf32>
    %19 = arith.subf %4, %18 : vector<10x32xf32>
    %cst_13 = arith.constant 9.99999974E-6 : f32
    %20 = vector.broadcast %cst_13 : f32 to vector<10x1xf32>
    %21 = arith.addf %17, %20 : vector<10x1xf32>
    %22 = math.rsqrt %21 : vector<10x1xf32>
    %23 = vector.broadcast %22 : vector<10x1xf32> to vector<10x32xf32>
    %24 = arith.mulf %19, %23 : vector<10x32xf32>
    %25 = vector.broadcast %5 : vector<1x32xf32> to vector<10x32xf32>
    %26 = arith.mulf %24, %25 : vector<10x32xf32>
    %27 = vector.broadcast %6 : vector<1x32xf32> to vector<10x32xf32>
    %28 = arith.addf %26, %27 : vector<10x32xf32>
    %c0_14 = arith.constant 0 : index
    %c0_15 = arith.constant 0 : index
    %29 = vector.load %arg2[%c0_14, %c0_15] : memref<10x10xf32, #tpu.memory_space<vmem>>, vector<10x10xf32>
    %c0_16 = arith.constant 0 : index
    %c0_17 = arith.constant 0 : index
    %c0_18 = arith.constant 0 : index
    %30 = vector.load %arg6[%c0_16, %c0_17, %c0_18] : memref<2x1x32xf32, #tpu.memory_space<vmem>>, vector<1x1x32xf32>
    %31 = vector.shape_cast %30 : vector<1x1x32xf32> to vector<1x32xf32>
    %c0_19 = arith.constant 0 : index
    %c0_20 = arith.constant 0 : index
    %c0_21 = arith.constant 0 : index
    %32 = vector.load %arg7[%c0_19, %c0_20, %c0_21] : memref<2x1x32xf32, #tpu.memory_space<vmem>>, vector<1x1x32xf32>
    %33 = vector.shape_cast %32 : vector<1x1x32xf32> to vector<1x32xf32>
    %cst_22 = arith.constant dense<0.000000e+00> : vector<10xf32>
    %34 = vector.multi_reduction <add>, %28, %cst_22 [1] : vector<10x32xf32> to vector<10xf32>
    %35 = vector.shape_cast %34 : vector<10xf32> to vector<10x1xf32>
    %36 = arith.mulf %28, %28 : vector<10x32xf32>
    %cst_23 = arith.constant dense<0.000000e+00> : vector<10xf32>
    %37 = vector.multi_reduction <add>, %36, %cst_23 [1] : vector<10x32xf32> to vector<10xf32>
    %38 = vector.shape_cast %37 : vector<10xf32> to vector<10x1xf32>
    %cst_24 = arith.constant 3.125000e-02 : f32
    %39 = vector.broadcast %cst_24 : f32 to vector<10x1xf32>
    %40 = arith.mulf %35, %39 : vector<10x1xf32>
    %cst_25 = arith.constant 3.125000e-02 : f32
    %41 = vector.broadcast %cst_25 : f32 to vector<10x1xf32>
    %42 = arith.mulf %38, %41 : vector<10x1xf32>
    %43 = arith.mulf %40, %40 : vector<10x1xf32>
    %44 = arith.subf %42, %43 : vector<10x1xf32>
    %45 = vector.broadcast %40 : vector<10x1xf32> to vector<10x32xf32>
    %46 = arith.subf %28, %45 : vector<10x32xf32>
    %cst_26 = arith.constant 9.99999974E-6 : f32
    %47 = vector.broadcast %cst_26 : f32 to vector<10x1xf32>
    %48 = arith.addf %44, %47 : vector<10x1xf32>
    %49 = math.rsqrt %48 : vector<10x1xf32>
    %50 = vector.broadcast %49 : vector<10x1xf32> to vector<10x32xf32>
    %51 = arith.mulf %46, %50 : vector<10x32xf32>
    %52 = vector.broadcast %31 : vector<1x32xf32> to vector<10x32xf32>
    %53 = arith.mulf %51, %52 : vector<10x32xf32>
    %54 = vector.broadcast %33 : vector<1x32xf32> to vector<10x32xf32>
    %55 = arith.addf %53, %54 : vector<10x32xf32>
    %c0_27 = arith.constant 0 : index
    %c0_28 = arith.constant 0 : index
    %c0_29 = arith.constant 0 : index
    %56 = vector.load %arg8[%c0_27, %c0_28, %c0_29] : memref<2x32x96xf32, #tpu.memory_space<vmem>>, vector<1x32x96xf32>
    %57 = vector.shape_cast %56 : vector<1x32x96xf32> to vector<32x96xf32>
    %cst_30 = arith.constant dense<0.000000e+00> : vector<10x96xf32>
    %58 = tpu.matmul %55, %57, %cst_30 {dimension_numbers = #tpu.dot_dimension_numbers<[1], [0], [0], [1], [0, 0, 1, 1], [], []>} : vector<10x32xf32>, vector<32x96xf32>, vector<10x96xf32> -> vector<10x96xf32>
    %c0_31 = arith.constant 0 : index
    %c0_32 = arith.constant 0 : index
    %c0_33 = arith.constant 0 : index
    %59 = vector.load %arg9[%c0_31, %c0_32, %c0_33] : memref<2x1x96xf32, #tpu.memory_space<vmem>>, vector<1x1x96xf32>
    %60 = vector.shape_cast %59 : vector<1x1x96xf32> to vector<1x96xf32>
    %61 = vector.broadcast %60 : vector<1x96xf32> to vector<10x96xf32>
    %62 = arith.addf %58, %61 : vector<10x96xf32>
    %63 = vector.extract_strided_slice %62 {offsets = [0, 0], sizes = [10, 8], strides = [1, 1]} : vector<10x96xf32> to vector<10x8xf32>
    %64 = vector.extract_strided_slice %62 {offsets = [0, 32], sizes = [10, 8], strides = [1, 1]} : vector<10x96xf32> to vector<10x8xf32>
    %65 = vector.extract_strided_slice %62 {offsets = [0, 64], sizes = [10, 8], strides = [1, 1]} : vector<10x96xf32> to vector<10x8xf32>
    %66 = tpu.transpose %64, [1, 0] : vector<10x8xf32> -> vector<8x10xf32>
    %cst_34 = arith.constant dense<0.000000e+00> : vector<10x10xf32>
    %67 = tpu.matmul %63, %66, %cst_34 {dimension_numbers = #tpu.dot_dimension_numbers<[1], [0], [0], [1], [0, 0, 1, 1], [], []>} : vector<10x8xf32>, vector<8x10xf32>, vector<10x10xf32> -> vector<10x10xf32>
    %68 = arith.addf %67, %29 : vector<10x10xf32>
    %cst_35 = arith.constant dense<0xFF800000> : vector<10xf32>
    %69 = vector.multi_reduction <maximumf>, %68, %cst_35 [1] : vector<10x10xf32> to vector<10xf32>
    %70 = vector.shape_cast %69 : vector<10xf32> to vector<10x1xf32>
    %71 = vector.broadcast %70 : vector<10x1xf32> to vector<10x10xf32>
    %72 = arith.subf %68, %71 : vector<10x10xf32>
    %73 = math.exp %72 : vector<10x10xf32>
    %cst_36 = arith.constant dense<0.000000e+00> : vector<10xf32>
    %74 = vector.multi_reduction <add>, %73, %cst_36 [1] : vector<10x10xf32> to vector<10xf32>
    %75 = vector.shape_cast %74 : vector<10xf32> to vector<10x1xf32>
    %76 = tpu.reciprocal %75 {approx = true} : vector<10x1xf32> -> vector<10x1xf32>
    %77 = vector.broadcast %76 : vector<10x1xf32> to vector<10x10xf32>
    %78 = arith.mulf %73, %77 : vector<10x10xf32>
    %cst_37 = arith.constant dense<0.000000e+00> : vector<10x8xf32>
    %79 = tpu.matmul %78, %65, %cst_37 {dimension_numbers = #tpu.dot_dimension_numbers<[1], [0], [0], [1], [0, 0, 1, 1], [], []>} : vector<10x10xf32>, vector<10x8xf32>, vector<10x8xf32> -> vector<10x8xf32>
    %80 = vector.extract_strided_slice %62 {offsets = [0, 8], sizes = [10, 8], strides = [1, 1]} : vector<10x96xf32> to vector<10x8xf32>
    %81 = vector.extract_strided_slice %62 {offsets = [0, 40], sizes = [10, 8], strides = [1, 1]} : vector<10x96xf32> to vector<10x8xf32>
    %82 = vector.extract_strided_slice %62 {offsets = [0, 72], sizes = [10, 8], strides = [1, 1]} : vector<10x96xf32> to vector<10x8xf32>
    %83 = tpu.transpose %81, [1, 0] : vector<10x8xf32> -> vector<8x10xf32>
    %cst_38 = arith.constant dense<0.000000e+00> : vector<10x10xf32>
    %84 = tpu.matmul %80, %83, %cst_38 {dimension_numbers = #tpu.dot_dimension_numbers<[1], [0], [0], [1], [0, 0, 1, 1], [], []>} : vector<10x8xf32>, vector<8x10xf32>, vector<10x10xf32> -> vector<10x10xf32>
    %85 = arith.addf %84, %29 : vector<10x10xf32>
    %cst_39 = arith.constant dense<0xFF800000> : vector<10xf32>
    %86 = vector.multi_reduction <maximumf>, %85, %cst_39 [1] : vector<10x10xf32> to vector<10xf32>
    %87 = vector.shape_cast %86 : vector<10xf32> to vector<10x1xf32>
    %88 = vector.broadcast %87 : vector<10x1xf32> to vector<10x10xf32>
    %89 = arith.subf %85, %88 : vector<10x10xf32>
    %90 = math.exp %89 : vector<10x10xf32>
    %cst_40 = arith.constant dense<0.000000e+00> : vector<10xf32>
    %91 = vector.multi_reduction <add>, %90, %cst_40 [1] : vector<10x10xf32> to vector<10xf32>
    %92 = vector.shape_cast %91 : vector<10xf32> to vector<10x1xf32>
    %93 = tpu.reciprocal %92 {approx = true} : vector<10x1xf32> -> vector<10x1xf32>
    %94 = vector.broadcast %93 : vector<10x1xf32> to vector<10x10xf32>
    %95 = arith.mulf %90, %94 : vector<10x10xf32>
    %cst_41 = arith.constant dense<0.000000e+00> : vector<10x8xf32>
    %96 = tpu.matmul %95, %82, %cst_41 {dimension_numbers = #tpu.dot_dimension_numbers<[1], [0], [0], [1], [0, 0, 1, 1], [], []>} : vector<10x10xf32>, vector<10x8xf32>, vector<10x8xf32> -> vector<10x8xf32>
    %97 = vector.extract_strided_slice %62 {offsets = [0, 16], sizes = [10, 8], strides = [1, 1]} : vector<10x96xf32> to vector<10x8xf32>
    %98 = vector.extract_strided_slice %62 {offsets = [0, 48], sizes = [10, 8], strides = [1, 1]} : vector<10x96xf32> to vector<10x8xf32>
    %99 = vector.extract_strided_slice %62 {offsets = [0, 80], sizes = [10, 8], strides = [1, 1]} : vector<10x96xf32> to vector<10x8xf32>
    %100 = tpu.transpose %98, [1, 0] : vector<10x8xf32> -> vector<8x10xf32>
    %cst_42 = arith.constant dense<0.000000e+00> : vector<10x10xf32>
    %101 = tpu.matmul %97, %100, %cst_42 {dimension_numbers = #tpu.dot_dimension_numbers<[1], [0], [0], [1], [0, 0, 1, 1], [], []>} : vector<10x8xf32>, vector<8x10xf32>, vector<10x10xf32> -> vector<10x10xf32>
    %102 = arith.addf %101, %29 : vector<10x10xf32>
    %cst_43 = arith.constant dense<0xFF800000> : vector<10xf32>
    %103 = vector.multi_reduction <maximumf>, %102, %cst_43 [1] : vector<10x10xf32> to vector<10xf32>
    %104 = vector.shape_cast %103 : vector<10xf32> to vector<10x1xf32>
    %105 = vector.broadcast %104 : vector<10x1xf32> to vector<10x10xf32>
    %106 = arith.subf %102, %105 : vector<10x10xf32>
    %107 = math.exp %106 : vector<10x10xf32>
    %cst_44 = arith.constant dense<0.000000e+00> : vector<10xf32>
    %108 = vector.multi_reduction <add>, %107, %cst_44 [1] : vector<10x10xf32> to vector<10xf32>
    %109 = vector.shape_cast %108 : vector<10xf32> to vector<10x1xf32>
    %110 = tpu.reciprocal %109 {approx = true} : vector<10x1xf32> -> vector<10x1xf32>
    %111 = vector.broadcast %110 : vector<10x1xf32> to vector<10x10xf32>
    %112 = arith.mulf %107, %111 : vector<10x10xf32>
    %cst_45 = arith.constant dense<0.000000e+00> : vector<10x8xf32>
    %113 = tpu.matmul %112, %99, %cst_45 {dimension_numbers = #tpu.dot_dimension_numbers<[1], [0], [0], [1], [0, 0, 1, 1], [], []>} : vector<10x10xf32>, vector<10x8xf32>, vector<10x8xf32> -> vector<10x8xf32>
    %114 = vector.extract_strided_slice %62 {offsets = [0, 24], sizes = [10, 8], strides = [1, 1]} : vector<10x96xf32> to vector<10x8xf32>
    %115 = vector.extract_strided_slice %62 {offsets = [0, 56], sizes = [10, 8], strides = [1, 1]} : vector<10x96xf32> to vector<10x8xf32>
    %116 = vector.extract_strided_slice %62 {offsets = [0, 88], sizes = [10, 8], strides = [1, 1]} : vector<10x96xf32> to vector<10x8xf32>
    %117 = tpu.transpose %115, [1, 0] : vector<10x8xf32> -> vector<8x10xf32>
    %cst_46 = arith.constant dense<0.000000e+00> : vector<10x10xf32>
    %118 = tpu.matmul %114, %117, %cst_46 {dimension_numbers = #tpu.dot_dimension_numbers<[1], [0], [0], [1], [0, 0, 1, 1], [], []>} : vector<10x8xf32>, vector<8x10xf32>, vector<10x10xf32> -> vector<10x10xf32>
    %119 = arith.addf %118, %29 : vector<10x10xf32>
    %cst_47 = arith.constant dense<0xFF800000> : vector<10xf32>
    %120 = vector.multi_reduction <maximumf>, %119, %cst_47 [1] : vector<10x10xf32> to vector<10xf32>
    %121 = vector.shape_cast %120 : vector<10xf32> to vector<10x1xf32>
    %122 = vector.broadcast %121 : vector<10x1xf32> to vector<10x10xf32>
    %123 = arith.subf %119, %122 : vector<10x10xf32>
    %124 = math.exp %123 : vector<10x10xf32>
    %cst_48 = arith.constant dense<0.000000e+00> : vector<10xf32>
    %125 = vector.multi_reduction <add>, %124, %cst_48 [1] : vector<10x10xf32> to vector<10xf32>
    %126 = vector.shape_cast %125 : vector<10xf32> to vector<10x1xf32>
    %127 = tpu.reciprocal %126 {approx = true} : vector<10x1xf32> -> vector<10x1xf32>
    %128 = vector.broadcast %127 : vector<10x1xf32> to vector<10x10xf32>
    %129 = arith.mulf %124, %128 : vector<10x10xf32>
    %cst_49 = arith.constant dense<0.000000e+00> : vector<10x8xf32>
    %130 = tpu.matmul %129, %116, %cst_49 {dimension_numbers = #tpu.dot_dimension_numbers<[1], [0], [0], [1], [0, 0, 1, 1], [], []>} : vector<10x10xf32>, vector<10x8xf32>, vector<10x8xf32> -> vector<10x8xf32>
    %131 = tpu.concatenate %79, %96, %113, %130 in 1 : vector<10x8xf32>, vector<10x8xf32>, vector<10x8xf32>, vector<10x8xf32> -> vector<10x32xf32>
    %c0_50 = arith.constant 0 : index
    %c0_51 = arith.constant 0 : index
    %c0_52 = arith.constant 0 : index
    %132 = vector.load %arg10[%c0_50, %c0_51, %c0_52] : memref<2x32x32xf32, #tpu.memory_space<vmem>>, vector<1x32x32xf32>
    %133 = vector.shape_cast %132 : vector<1x32x32xf32> to vector<32x32xf32>
    %cst_53 = arith.constant dense<0.000000e+00> : vector<10x32xf32>
    %134 = tpu.matmul %131, %133, %cst_53 {dimension_numbers = #tpu.dot_dimension_numbers<[1], [0], [0], [1], [0, 0, 1, 1], [], []>} : vector<10x32xf32>, vector<32x32xf32>, vector<10x32xf32> -> vector<10x32xf32>
    %135 = arith.addf %28, %134 : vector<10x32xf32>
    %c0_54 = arith.constant 0 : index
    %c0_55 = arith.constant 0 : index
    %c0_56 = arith.constant 0 : index
    %136 = vector.load %arg11[%c0_54, %c0_55, %c0_56] : memref<2x1x32xf32, #tpu.memory_space<vmem>>, vector<1x1x32xf32>
    %137 = vector.shape_cast %136 : vector<1x1x32xf32> to vector<1x32xf32>
    %138 = vector.broadcast %137 : vector<1x32xf32> to vector<10x32xf32>
    %139 = arith.addf %135, %138 : vector<10x32xf32>
    %c0_57 = arith.constant 0 : index
    %c0_58 = arith.constant 0 : index
    %c0_59 = arith.constant 0 : index
    %140 = vector.load %arg12[%c0_57, %c0_58, %c0_59] : memref<2x1x32xf32, #tpu.memory_space<vmem>>, vector<1x1x32xf32>
    %141 = vector.shape_cast %140 : vector<1x1x32xf32> to vector<1x32xf32>
    %c0_60 = arith.constant 0 : index
    %c0_61 = arith.constant 0 : index
    %c0_62 = arith.constant 0 : index
    %142 = vector.load %arg13[%c0_60, %c0_61, %c0_62] : memref<2x1x32xf32, #tpu.memory_space<vmem>>, vector<1x1x32xf32>
    %143 = vector.shape_cast %142 : vector<1x1x32xf32> to vector<1x32xf32>
    %cst_63 = arith.constant dense<0.000000e+00> : vector<10xf32>
    %144 = vector.multi_reduction <add>, %139, %cst_63 [1] : vector<10x32xf32> to vector<10xf32>
    %145 = vector.shape_cast %144 : vector<10xf32> to vector<10x1xf32>
    %146 = arith.mulf %139, %139 : vector<10x32xf32>
    %cst_64 = arith.constant dense<0.000000e+00> : vector<10xf32>
    %147 = vector.multi_reduction <add>, %146, %cst_64 [1] : vector<10x32xf32> to vector<10xf32>
    %148 = vector.shape_cast %147 : vector<10xf32> to vector<10x1xf32>
    %cst_65 = arith.constant 3.125000e-02 : f32
    %149 = vector.broadcast %cst_65 : f32 to vector<10x1xf32>
    %150 = arith.mulf %145, %149 : vector<10x1xf32>
    %cst_66 = arith.constant 3.125000e-02 : f32
    %151 = vector.broadcast %cst_66 : f32 to vector<10x1xf32>
    %152 = arith.mulf %148, %151 : vector<10x1xf32>
    %153 = arith.mulf %150, %150 : vector<10x1xf32>
    %154 = arith.subf %152, %153 : vector<10x1xf32>
    %155 = vector.broadcast %150 : vector<10x1xf32> to vector<10x32xf32>
    %156 = arith.subf %139, %155 : vector<10x32xf32>
    %cst_67 = arith.constant 9.99999974E-6 : f32
    %157 = vector.broadcast %cst_67 : f32 to vector<10x1xf32>
    %158 = arith.addf %154, %157 : vector<10x1xf32>
    %159 = math.rsqrt %158 : vector<10x1xf32>
    %160 = vector.broadcast %159 : vector<10x1xf32> to vector<10x32xf32>
    %161 = arith.mulf %156, %160 : vector<10x32xf32>
    %162 = vector.broadcast %141 : vector<1x32xf32> to vector<10x32xf32>
    %163 = arith.mulf %161, %162 : vector<10x32xf32>
    %164 = vector.broadcast %143 : vector<1x32xf32> to vector<10x32xf32>
    %165 = arith.addf %163, %164 : vector<10x32xf32>
    %c0_68 = arith.constant 0 : index
    %c0_69 = arith.constant 0 : index
    %c0_70 = arith.constant 0 : index
    %166 = vector.load %arg14[%c0_68, %c0_69, %c0_70] : memref<2x32x128xf32, #tpu.memory_space<vmem>>, vector<1x32x128xf32>
    %167 = vector.shape_cast %166 : vector<1x32x128xf32> to vector<32x128xf32>
    %cst_71 = arith.constant dense<0.000000e+00> : vector<10x128xf32>
    %168 = tpu.matmul %165, %167, %cst_71 {dimension_numbers = #tpu.dot_dimension_numbers<[1], [0], [0], [1], [0, 0, 1, 1], [], []>} : vector<10x32xf32>, vector<32x128xf32>, vector<10x128xf32> -> vector<10x128xf32>
    %c0_72 = arith.constant 0 : index
    %c0_73 = arith.constant 0 : index
    %c0_74 = arith.constant 0 : index
    %169 = vector.load %arg15[%c0_72, %c0_73, %c0_74] : memref<2x1x128xf32, #tpu.memory_space<vmem>>, vector<1x1x128xf32>
    %170 = vector.shape_cast %169 : vector<1x1x128xf32> to vector<1x128xf32>
    %171 = vector.broadcast %170 : vector<1x128xf32> to vector<10x128xf32>
    %172 = arith.addf %168, %171 : vector<10x128xf32>
    %173 = arith.mulf %172, %172 : vector<10x128xf32>
    %174 = arith.mulf %172, %173 : vector<10x128xf32>
    %cst_75 = arith.constant 4.471500e-02 : f32
    %175 = vector.broadcast %cst_75 : f32 to vector<10x128xf32>
    %176 = arith.mulf %175, %174 : vector<10x128xf32>
    %177 = arith.addf %172, %176 : vector<10x128xf32>
    %cst_76 = arith.constant 0.797884583 : f32
    %178 = vector.broadcast %cst_76 : f32 to vector<10x128xf32>
    %179 = arith.mulf %178, %177 : vector<10x128xf32>
    %180 = math.tanh %179 : vector<10x128xf32>
    %cst_77 = arith.constant 1.000000e+00 : f32
    %181 = vector.broadcast %cst_77 : f32 to vector<10x128xf32>
    %182 = arith.addf %181, %180 : vector<10x128xf32>
    %cst_78 = arith.constant 5.000000e-01 : f32
    %183 = vector.broadcast %cst_78 : f32 to vector<10x128xf32>
    %184 = arith.mulf %183, %182 : vector<10x128xf32>
    %185 = arith.mulf %172, %184 : vector<10x128xf32>
    %c0_79 = arith.constant 0 : index
    %c0_80 = arith.constant 0 : index
    %c0_81 = arith.constant 0 : index
    %186 = vector.load %arg16[%c0_79, %c0_80, %c0_81] : memref<2x128x32xf32, #tpu.memory_space<vmem>>, vector<1x128x32xf32>
    %187 = vector.shape_cast %186 : vector<1x128x32xf32> to vector<128x32xf32>
    %cst_82 = arith.constant dense<0.000000e+00> : vector<10x32xf32>
    %188 = tpu.matmul %185, %187, %cst_82 {dimension_numbers = #tpu.dot_dimension_numbers<[1], [0], [0], [1], [0, 0, 1, 1], [], []>} : vector<10x128xf32>, vector<128x32xf32>, vector<10x32xf32> -> vector<10x32xf32>
    %c0_83 = arith.constant 0 : index
    %c0_84 = arith.constant 0 : index
    %c0_85 = arith.constant 0 : index
    %189 = vector.load %arg17[%c0_83, %c0_84, %c0_85] : memref<2x1x32xf32, #tpu.memory_space<vmem>>, vector<1x1x32xf32>
    %190 = vector.shape_cast %189 : vector<1x1x32xf32> to vector<1x32xf32>
    %191 = vector.broadcast %190 : vector<1x32xf32> to vector<10x32xf32>
    %192 = arith.addf %188, %191 : vector<10x32xf32>
    %193 = arith.addf %139, %192 : vector<10x32xf32>
    %c1 = arith.constant 1 : index
    %c0_86 = arith.constant 0 : index
    %c0_87 = arith.constant 0 : index
    %194 = vector.load %arg6[%c1, %c0_86, %c0_87] : memref<2x1x32xf32, #tpu.memory_space<vmem>>, vector<1x1x32xf32>
    %195 = vector.shape_cast %194 : vector<1x1x32xf32> to vector<1x32xf32>
    %c1_88 = arith.constant 1 : index
    %c0_89 = arith.constant 0 : index
    %c0_90 = arith.constant 0 : index
    %196 = vector.load %arg7[%c1_88, %c0_89, %c0_90] : memref<2x1x32xf32, #tpu.memory_space<vmem>>, vector<1x1x32xf32>
    %197 = vector.shape_cast %196 : vector<1x1x32xf32> to vector<1x32xf32>
    %cst_91 = arith.constant dense<0.000000e+00> : vector<10xf32>
    %198 = vector.multi_reduction <add>, %193, %cst_91 [1] : vector<10x32xf32> to vector<10xf32>
    %199 = vector.shape_cast %198 : vector<10xf32> to vector<10x1xf32>
    %200 = arith.mulf %193, %193 : vector<10x32xf32>
    %cst_92 = arith.constant dense<0.000000e+00> : vector<10xf32>
    %201 = vector.multi_reduction <add>, %200, %cst_92 [1] : vector<10x32xf32> to vector<10xf32>
    %202 = vector.shape_cast %201 : vector<10xf32> to vector<10x1xf32>
    %cst_93 = arith.constant 3.125000e-02 : f32
    %203 = vector.broadcast %cst_93 : f32 to vector<10x1xf32>
    %204 = arith.mulf %199, %203 : vector<10x1xf32>
    %cst_94 = arith.constant 3.125000e-02 : f32
    %205 = vector.broadcast %cst_94 : f32 to vector<10x1xf32>
    %206 = arith.mulf %202, %205 : vector<10x1xf32>
    %207 = arith.mulf %204, %204 : vector<10x1xf32>
    %208 = arith.subf %206, %207 : vector<10x1xf32>
    %209 = vector.broadcast %204 : vector<10x1xf32> to vector<10x32xf32>
    %210 = arith.subf %193, %209 : vector<10x32xf32>
    %cst_95 = arith.constant 9.99999974E-6 : f32
    %211 = vector.broadcast %cst_95 : f32 to vector<10x1xf32>
    %212 = arith.addf %208, %211 : vector<10x1xf32>
    %213 = math.rsqrt %212 : vector<10x1xf32>
    %214 = vector.broadcast %213 : vector<10x1xf32> to vector<10x32xf32>
    %215 = arith.mulf %210, %214 : vector<10x32xf32>
    %216 = vector.broadcast %195 : vector<1x32xf32> to vector<10x32xf32>
    %217 = arith.mulf %215, %216 : vector<10x32xf32>
    %218 = vector.broadcast %197 : vector<1x32xf32> to vector<10x32xf32>
    %219 = arith.addf %217, %218 : vector<10x32xf32>
    %c1_96 = arith.constant 1 : index
    %c0_97 = arith.constant 0 : index
    %c0_98 = arith.constant 0 : index
    %220 = vector.load %arg8[%c1_96, %c0_97, %c0_98] : memref<2x32x96xf32, #tpu.memory_space<vmem>>, vector<1x32x96xf32>
    %221 = vector.shape_cast %220 : vector<1x32x96xf32> to vector<32x96xf32>
    %cst_99 = arith.constant dense<0.000000e+00> : vector<10x96xf32>
    %222 = tpu.matmul %219, %221, %cst_99 {dimension_numbers = #tpu.dot_dimension_numbers<[1], [0], [0], [1], [0, 0, 1, 1], [], []>} : vector<10x32xf32>, vector<32x96xf32>, vector<10x96xf32> -> vector<10x96xf32>
    %c1_100 = arith.constant 1 : index
    %c0_101 = arith.constant 0 : index
    %c0_102 = arith.constant 0 : index
    %223 = vector.load %arg9[%c1_100, %c0_101, %c0_102] : memref<2x1x96xf32, #tpu.memory_space<vmem>>, vector<1x1x96xf32>
    %224 = vector.shape_cast %223 : vector<1x1x96xf32> to vector<1x96xf32>
    %225 = vector.broadcast %224 : vector<1x96xf32> to vector<10x96xf32>
    %226 = arith.addf %222, %225 : vector<10x96xf32>
    %227 = vector.extract_strided_slice %226 {offsets = [0, 0], sizes = [10, 8], strides = [1, 1]} : vector<10x96xf32> to vector<10x8xf32>
    %228 = vector.extract_strided_slice %226 {offsets = [0, 32], sizes = [10, 8], strides = [1, 1]} : vector<10x96xf32> to vector<10x8xf32>
    %229 = vector.extract_strided_slice %226 {offsets = [0, 64], sizes = [10, 8], strides = [1, 1]} : vector<10x96xf32> to vector<10x8xf32>
    %230 = tpu.transpose %228, [1, 0] : vector<10x8xf32> -> vector<8x10xf32>
    %cst_103 = arith.constant dense<0.000000e+00> : vector<10x10xf32>
    %231 = tpu.matmul %227, %230, %cst_103 {dimension_numbers = #tpu.dot_dimension_numbers<[1], [0], [0], [1], [0, 0, 1, 1], [], []>} : vector<10x8xf32>, vector<8x10xf32>, vector<10x10xf32> -> vector<10x10xf32>
    %232 = arith.addf %231, %29 : vector<10x10xf32>
    %cst_104 = arith.constant dense<0xFF800000> : vector<10xf32>
    %233 = vector.multi_reduction <maximumf>, %232, %cst_104 [1] : vector<10x10xf32> to vector<10xf32>
    %234 = vector.shape_cast %233 : vector<10xf32> to vector<10x1xf32>
    %235 = vector.broadcast %234 : vector<10x1xf32> to vector<10x10xf32>
    %236 = arith.subf %232, %235 : vector<10x10xf32>
    %237 = math.exp %236 : vector<10x10xf32>
    %cst_105 = arith.constant dense<0.000000e+00> : vector<10xf32>
    %238 = vector.multi_reduction <add>, %237, %cst_105 [1] : vector<10x10xf32> to vector<10xf32>
    %239 = vector.shape_cast %238 : vector<10xf32> to vector<10x1xf32>
    %240 = tpu.reciprocal %239 {approx = true} : vector<10x1xf32> -> vector<10x1xf32>
    %241 = vector.broadcast %240 : vector<10x1xf32> to vector<10x10xf32>
    %242 = arith.mulf %237, %241 : vector<10x10xf32>
    %cst_106 = arith.constant dense<0.000000e+00> : vector<10x8xf32>
    %243 = tpu.matmul %242, %229, %cst_106 {dimension_numbers = #tpu.dot_dimension_numbers<[1], [0], [0], [1], [0, 0, 1, 1], [], []>} : vector<10x10xf32>, vector<10x8xf32>, vector<10x8xf32> -> vector<10x8xf32>
    %244 = vector.extract_strided_slice %226 {offsets = [0, 8], sizes = [10, 8], strides = [1, 1]} : vector<10x96xf32> to vector<10x8xf32>
    %245 = vector.extract_strided_slice %226 {offsets = [0, 40], sizes = [10, 8], strides = [1, 1]} : vector<10x96xf32> to vector<10x8xf32>
    %246 = vector.extract_strided_slice %226 {offsets = [0, 72], sizes = [10, 8], strides = [1, 1]} : vector<10x96xf32> to vector<10x8xf32>
    %247 = tpu.transpose %245, [1, 0] : vector<10x8xf32> -> vector<8x10xf32>
    %cst_107 = arith.constant dense<0.000000e+00> : vector<10x10xf32>
    %248 = tpu.matmul %244, %247, %cst_107 {dimension_numbers = #tpu.dot_dimension_numbers<[1], [0], [0], [1], [0, 0, 1, 1], [], []>} : vector<10x8xf32>, vector<8x10xf32>, vector<10x10xf32> -> vector<10x10xf32>
    %249 = arith.addf %248, %29 : vector<10x10xf32>
    %cst_108 = arith.constant dense<0xFF800000> : vector<10xf32>
    %250 = vector.multi_reduction <maximumf>, %249, %cst_108 [1] : vector<10x10xf32> to vector<10xf32>
    %251 = vector.shape_cast %250 : vector<10xf32> to vector<10x1xf32>
    %252 = vector.broadcast %251 : vector<10x1xf32> to vector<10x10xf32>
    %253 = arith.subf %249, %252 : vector<10x10xf32>
    %254 = math.exp %253 : vector<10x10xf32>
    %cst_109 = arith.constant dense<0.000000e+00> : vector<10xf32>
    %255 = vector.multi_reduction <add>, %254, %cst_109 [1] : vector<10x10xf32> to vector<10xf32>
    %256 = vector.shape_cast %255 : vector<10xf32> to vector<10x1xf32>
    %257 = tpu.reciprocal %256 {approx = true} : vector<10x1xf32> -> vector<10x1xf32>
    %258 = vector.broadcast %257 : vector<10x1xf32> to vector<10x10xf32>
    %259 = arith.mulf %254, %258 : vector<10x10xf32>
    %cst_110 = arith.constant dense<0.000000e+00> : vector<10x8xf32>
    %260 = tpu.matmul %259, %246, %cst_110 {dimension_numbers = #tpu.dot_dimension_numbers<[1], [0], [0], [1], [0, 0, 1, 1], [], []>} : vector<10x10xf32>, vector<10x8xf32>, vector<10x8xf32> -> vector<10x8xf32>
    %261 = vector.extract_strided_slice %226 {offsets = [0, 16], sizes = [10, 8], strides = [1, 1]} : vector<10x96xf32> to vector<10x8xf32>
    %262 = vector.extract_strided_slice %226 {offsets = [0, 48], sizes = [10, 8], strides = [1, 1]} : vector<10x96xf32> to vector<10x8xf32>
    %263 = vector.extract_strided_slice %226 {offsets = [0, 80], sizes = [10, 8], strides = [1, 1]} : vector<10x96xf32> to vector<10x8xf32>
    %264 = tpu.transpose %262, [1, 0] : vector<10x8xf32> -> vector<8x10xf32>
    %cst_111 = arith.constant dense<0.000000e+00> : vector<10x10xf32>
    %265 = tpu.matmul %261, %264, %cst_111 {dimension_numbers = #tpu.dot_dimension_numbers<[1], [0], [0], [1], [0, 0, 1, 1], [], []>} : vector<10x8xf32>, vector<8x10xf32>, vector<10x10xf32> -> vector<10x10xf32>
    %266 = arith.addf %265, %29 : vector<10x10xf32>
    %cst_112 = arith.constant dense<0xFF800000> : vector<10xf32>
    %267 = vector.multi_reduction <maximumf>, %266, %cst_112 [1] : vector<10x10xf32> to vector<10xf32>
    %268 = vector.shape_cast %267 : vector<10xf32> to vector<10x1xf32>
    %269 = vector.broadcast %268 : vector<10x1xf32> to vector<10x10xf32>
    %270 = arith.subf %266, %269 : vector<10x10xf32>
    %271 = math.exp %270 : vector<10x10xf32>
    %cst_113 = arith.constant dense<0.000000e+00> : vector<10xf32>
    %272 = vector.multi_reduction <add>, %271, %cst_113 [1] : vector<10x10xf32> to vector<10xf32>
    %273 = vector.shape_cast %272 : vector<10xf32> to vector<10x1xf32>
    %274 = tpu.reciprocal %273 {approx = true} : vector<10x1xf32> -> vector<10x1xf32>
    %275 = vector.broadcast %274 : vector<10x1xf32> to vector<10x10xf32>
    %276 = arith.mulf %271, %275 : vector<10x10xf32>
    %cst_114 = arith.constant dense<0.000000e+00> : vector<10x8xf32>
    %277 = tpu.matmul %276, %263, %cst_114 {dimension_numbers = #tpu.dot_dimension_numbers<[1], [0], [0], [1], [0, 0, 1, 1], [], []>} : vector<10x10xf32>, vector<10x8xf32>, vector<10x8xf32> -> vector<10x8xf32>
    %278 = vector.extract_strided_slice %226 {offsets = [0, 24], sizes = [10, 8], strides = [1, 1]} : vector<10x96xf32> to vector<10x8xf32>
    %279 = vector.extract_strided_slice %226 {offsets = [0, 56], sizes = [10, 8], strides = [1, 1]} : vector<10x96xf32> to vector<10x8xf32>
    %280 = vector.extract_strided_slice %226 {offsets = [0, 88], sizes = [10, 8], strides = [1, 1]} : vector<10x96xf32> to vector<10x8xf32>
    %281 = tpu.transpose %279, [1, 0] : vector<10x8xf32> -> vector<8x10xf32>
    %cst_115 = arith.constant dense<0.000000e+00> : vector<10x10xf32>
    %282 = tpu.matmul %278, %281, %cst_115 {dimension_numbers = #tpu.dot_dimension_numbers<[1], [0], [0], [1], [0, 0, 1, 1], [], []>} : vector<10x8xf32>, vector<8x10xf32>, vector<10x10xf32> -> vector<10x10xf32>
    %283 = arith.addf %282, %29 : vector<10x10xf32>
    %cst_116 = arith.constant dense<0xFF800000> : vector<10xf32>
    %284 = vector.multi_reduction <maximumf>, %283, %cst_116 [1] : vector<10x10xf32> to vector<10xf32>
    %285 = vector.shape_cast %284 : vector<10xf32> to vector<10x1xf32>
    %286 = vector.broadcast %285 : vector<10x1xf32> to vector<10x10xf32>
    %287 = arith.subf %283, %286 : vector<10x10xf32>
    %288 = math.exp %287 : vector<10x10xf32>
    %cst_117 = arith.constant dense<0.000000e+00> : vector<10xf32>
    %289 = vector.multi_reduction <add>, %288, %cst_117 [1] : vector<10x10xf32> to vector<10xf32>
    %290 = vector.shape_cast %289 : vector<10xf32> to vector<10x1xf32>
    %291 = tpu.reciprocal %290 {approx = true} : vector<10x1xf32> -> vector<10x1xf32>
    %292 = vector.broadcast %291 : vector<10x1xf32> to vector<10x10xf32>
    %293 = arith.mulf %288, %292 : vector<10x10xf32>
    %cst_118 = arith.constant dense<0.000000e+00> : vector<10x8xf32>
    %294 = tpu.matmul %293, %280, %cst_118 {dimension_numbers = #tpu.dot_dimension_numbers<[1], [0], [0], [1], [0, 0, 1, 1], [], []>} : vector<10x10xf32>, vector<10x8xf32>, vector<10x8xf32> -> vector<10x8xf32>
    %295 = tpu.concatenate %243, %260, %277, %294 in 1 : vector<10x8xf32>, vector<10x8xf32>, vector<10x8xf32>, vector<10x8xf32> -> vector<10x32xf32>
    %c1_119 = arith.constant 1 : index
    %c0_120 = arith.constant 0 : index
    %c0_121 = arith.constant 0 : index
    %296 = vector.load %arg10[%c1_119, %c0_120, %c0_121] : memref<2x32x32xf32, #tpu.memory_space<vmem>>, vector<1x32x32xf32>
    %297 = vector.shape_cast %296 : vector<1x32x32xf32> to vector<32x32xf32>
    %cst_122 = arith.constant dense<0.000000e+00> : vector<10x32xf32>
    %298 = tpu.matmul %295, %297, %cst_122 {dimension_numbers = #tpu.dot_dimension_numbers<[1], [0], [0], [1], [0, 0, 1, 1], [], []>} : vector<10x32xf32>, vector<32x32xf32>, vector<10x32xf32> -> vector<10x32xf32>
    %299 = arith.addf %193, %298 : vector<10x32xf32>
    %c1_123 = arith.constant 1 : index
    %c0_124 = arith.constant 0 : index
    %c0_125 = arith.constant 0 : index
    %300 = vector.load %arg11[%c1_123, %c0_124, %c0_125] : memref<2x1x32xf32, #tpu.memory_space<vmem>>, vector<1x1x32xf32>
    %301 = vector.shape_cast %300 : vector<1x1x32xf32> to vector<1x32xf32>
    %302 = vector.broadcast %301 : vector<1x32xf32> to vector<10x32xf32>
    %303 = arith.addf %299, %302 : vector<10x32xf32>
    %c1_126 = arith.constant 1 : index
    %c0_127 = arith.constant 0 : index
    %c0_128 = arith.constant 0 : index
    %304 = vector.load %arg12[%c1_126, %c0_127, %c0_128] : memref<2x1x32xf32, #tpu.memory_space<vmem>>, vector<1x1x32xf32>
    %305 = vector.shape_cast %304 : vector<1x1x32xf32> to vector<1x32xf32>
    %c1_129 = arith.constant 1 : index
    %c0_130 = arith.constant 0 : index
    %c0_131 = arith.constant 0 : index
    %306 = vector.load %arg13[%c1_129, %c0_130, %c0_131] : memref<2x1x32xf32, #tpu.memory_space<vmem>>, vector<1x1x32xf32>
    %307 = vector.shape_cast %306 : vector<1x1x32xf32> to vector<1x32xf32>
    %cst_132 = arith.constant dense<0.000000e+00> : vector<10xf32>
    %308 = vector.multi_reduction <add>, %303, %cst_132 [1] : vector<10x32xf32> to vector<10xf32>
    %309 = vector.shape_cast %308 : vector<10xf32> to vector<10x1xf32>
    %310 = arith.mulf %303, %303 : vector<10x32xf32>
    %cst_133 = arith.constant dense<0.000000e+00> : vector<10xf32>
    %311 = vector.multi_reduction <add>, %310, %cst_133 [1] : vector<10x32xf32> to vector<10xf32>
    %312 = vector.shape_cast %311 : vector<10xf32> to vector<10x1xf32>
    %cst_134 = arith.constant 3.125000e-02 : f32
    %313 = vector.broadcast %cst_134 : f32 to vector<10x1xf32>
    %314 = arith.mulf %309, %313 : vector<10x1xf32>
    %cst_135 = arith.constant 3.125000e-02 : f32
    %315 = vector.broadcast %cst_135 : f32 to vector<10x1xf32>
    %316 = arith.mulf %312, %315 : vector<10x1xf32>
    %317 = arith.mulf %314, %314 : vector<10x1xf32>
    %318 = arith.subf %316, %317 : vector<10x1xf32>
    %319 = vector.broadcast %314 : vector<10x1xf32> to vector<10x32xf32>
    %320 = arith.subf %303, %319 : vector<10x32xf32>
    %cst_136 = arith.constant 9.99999974E-6 : f32
    %321 = vector.broadcast %cst_136 : f32 to vector<10x1xf32>
    %322 = arith.addf %318, %321 : vector<10x1xf32>
    %323 = math.rsqrt %322 : vector<10x1xf32>
    %324 = vector.broadcast %323 : vector<10x1xf32> to vector<10x32xf32>
    %325 = arith.mulf %320, %324 : vector<10x32xf32>
    %326 = vector.broadcast %305 : vector<1x32xf32> to vector<10x32xf32>
    %327 = arith.mulf %325, %326 : vector<10x32xf32>
    %328 = vector.broadcast %307 : vector<1x32xf32> to vector<10x32xf32>
    %329 = arith.addf %327, %328 : vector<10x32xf32>
    %c1_137 = arith.constant 1 : index
    %c0_138 = arith.constant 0 : index
    %c0_139 = arith.constant 0 : index
    %330 = vector.load %arg14[%c1_137, %c0_138, %c0_139] : memref<2x32x128xf32, #tpu.memory_space<vmem>>, vector<1x32x128xf32>
    %331 = vector.shape_cast %330 : vector<1x32x128xf32> to vector<32x128xf32>
    %cst_140 = arith.constant dense<0.000000e+00> : vector<10x128xf32>
    %332 = tpu.matmul %329, %331, %cst_140 {dimension_numbers = #tpu.dot_dimension_numbers<[1], [0], [0], [1], [0, 0, 1, 1], [], []>} : vector<10x32xf32>, vector<32x128xf32>, vector<10x128xf32> -> vector<10x128xf32>
    %c1_141 = arith.constant 1 : index
    %c0_142 = arith.constant 0 : index
    %c0_143 = arith.constant 0 : index
    %333 = vector.load %arg15[%c1_141, %c0_142, %c0_143] : memref<2x1x128xf32, #tpu.memory_space<vmem>>, vector<1x1x128xf32>
    %334 = vector.shape_cast %333 : vector<1x1x128xf32> to vector<1x128xf32>
    %335 = vector.broadcast %334 : vector<1x128xf32> to vector<10x128xf32>
    %336 = arith.addf %332, %335 : vector<10x128xf32>
    %337 = arith.mulf %336, %336 : vector<10x128xf32>
    %338 = arith.mulf %336, %337 : vector<10x128xf32>
    %cst_144 = arith.constant 4.471500e-02 : f32
    %339 = vector.broadcast %cst_144 : f32 to vector<10x128xf32>
    %340 = arith.mulf %339, %338 : vector<10x128xf32>
    %341 = arith.addf %336, %340 : vector<10x128xf32>
    %cst_145 = arith.constant 0.797884583 : f32
    %342 = vector.broadcast %cst_145 : f32 to vector<10x128xf32>
    %343 = arith.mulf %342, %341 : vector<10x128xf32>
    %344 = math.tanh %343 : vector<10x128xf32>
    %cst_146 = arith.constant 1.000000e+00 : f32
    %345 = vector.broadcast %cst_146 : f32 to vector<10x128xf32>
    %346 = arith.addf %345, %344 : vector<10x128xf32>
    %cst_147 = arith.constant 5.000000e-01 : f32
    %347 = vector.broadcast %cst_147 : f32 to vector<10x128xf32>
    %348 = arith.mulf %347, %346 : vector<10x128xf32>
    %349 = arith.mulf %336, %348 : vector<10x128xf32>
    %c1_148 = arith.constant 1 : index
    %c0_149 = arith.constant 0 : index
    %c0_150 = arith.constant 0 : index
    %350 = vector.load %arg16[%c1_148, %c0_149, %c0_150] : memref<2x128x32xf32, #tpu.memory_space<vmem>>, vector<1x128x32xf32>
    %351 = vector.shape_cast %350 : vector<1x128x32xf32> to vector<128x32xf32>
    %cst_151 = arith.constant dense<0.000000e+00> : vector<10x32xf32>
    %352 = tpu.matmul %349, %351, %cst_151 {dimension_numbers = #tpu.dot_dimension_numbers<[1], [0], [0], [1], [0, 0, 1, 1], [], []>} : vector<10x128xf32>, vector<128x32xf32>, vector<10x32xf32> -> vector<10x32xf32>
    %c1_152 = arith.constant 1 : index
    %c0_153 = arith.constant 0 : index
    %c0_154 = arith.constant 0 : index
    %353 = vector.load %arg17[%c1_152, %c0_153, %c0_154] : memref<2x1x32xf32, #tpu.memory_space<vmem>>, vector<1x1x32xf32>
    %354 = vector.shape_cast %353 : vector<1x1x32xf32> to vector<1x32xf32>
    %355 = vector.broadcast %354 : vector<1x32xf32> to vector<10x32xf32>
    %356 = arith.addf %352, %355 : vector<10x32xf32>
    %357 = arith.addf %303, %356 : vector<10x32xf32>
    %358 = vector.extract_strided_slice %357 {offsets = [0, 0], sizes = [1, 32], strides = [1, 1]} : vector<10x32xf32> to vector<1x32xf32>
    %359 = vector.extract_strided_slice %357 {offsets = [5, 0], sizes = [1, 32], strides = [1, 1]} : vector<10x32xf32> to vector<1x32xf32>
    %360 = tpu.concatenate %358, %359 in 0 : vector<1x32xf32>, vector<1x32xf32> -> vector<2x32xf32>
    %c0_155 = arith.constant 0 : index
    %c0_156 = arith.constant 0 : index
    %361 = vector.load %arg18[%c0_155, %c0_156] : memref<1x32xf32, #tpu.memory_space<vmem>>, vector<1x32xf32>
    %c0_157 = arith.constant 0 : index
    %c0_158 = arith.constant 0 : index
    %362 = vector.load %arg19[%c0_157, %c0_158] : memref<1x32xf32, #tpu.memory_space<vmem>>, vector<1x32xf32>
    %cst_159 = arith.constant dense<0.000000e+00> : vector<2xf32>
    %363 = vector.multi_reduction <add>, %360, %cst_159 [1] : vector<2x32xf32> to vector<2xf32>
    %364 = vector.shape_cast %363 : vector<2xf32> to vector<2x1xf32>
    %365 = arith.mulf %360, %360 : vector<2x32xf32>
    %cst_160 = arith.constant dense<0.000000e+00> : vector<2xf32>
    %366 = vector.multi_reduction <add>, %365, %cst_160 [1] : vector<2x32xf32> to vector<2xf32>
    %367 = vector.shape_cast %366 : vector<2xf32> to vector<2x1xf32>
    %cst_161 = arith.constant 3.125000e-02 : f32
    %368 = vector.broadcast %cst_161 : f32 to vector<2x1xf32>
    %369 = arith.mulf %364, %368 : vector<2x1xf32>
    %cst_162 = arith.constant 3.125000e-02 : f32
    %370 = vector.broadcast %cst_162 : f32 to vector<2x1xf32>
    %371 = arith.mulf %367, %370 : vector<2x1xf32>
    %372 = arith.mulf %369, %369 : vector<2x1xf32>
    %373 = arith.subf %371, %372 : vector<2x1xf32>
    %374 = vector.broadcast %369 : vector<2x1xf32> to vector<2x32xf32>
    %375 = arith.subf %360, %374 : vector<2x32xf32>
    %cst_163 = arith.constant 9.99999974E-6 : f32
    %376 = vector.broadcast %cst_163 : f32 to vector<2x1xf32>
    %377 = arith.addf %373, %376 : vector<2x1xf32>
    %378 = math.rsqrt %377 : vector<2x1xf32>
    %379 = vector.broadcast %378 : vector<2x1xf32> to vector<2x32xf32>
    %380 = arith.mulf %375, %379 : vector<2x32xf32>
    %381 = vector.broadcast %361 : vector<1x32xf32> to vector<2x32xf32>
    %382 = arith.mulf %380, %381 : vector<2x32xf32>
    %383 = vector.broadcast %362 : vector<1x32xf32> to vector<2x32xf32>
    %384 = arith.addf %382, %383 : vector<2x32xf32>
    %c0_164 = arith.constant 0 : index
    %c0_165 = arith.constant 0 : index
    %385 = vector.load %arg20[%c0_164, %c0_165] : memref<32x32xf32, #tpu.memory_space<vmem>>, vector<32x32xf32>
    %cst_166 = arith.constant dense<0.000000e+00> : vector<2x32xf32>
    %386 = tpu.matmul %384, %385, %cst_166 {dimension_numbers = #tpu.dot_dimension_numbers<[1], [0], [0], [1], [0, 0, 1, 1], [], []>} : vector<2x32xf32>, vector<32x32xf32>, vector<2x32xf32> -> vector<2x32xf32>
    %387 = arith.mulf %386, %386 : vector<2x32xf32>
    %cst_167 = arith.constant dense<0.000000e+00> : vector<2xf32>
    %388 = vector.multi_reduction <add>, %387, %cst_167 [1] : vector<2x32xf32> to vector<2xf32>
    %389 = vector.shape_cast %388 : vector<2xf32> to vector<2x1xf32>
    %cst_168 = arith.constant 9.99999996E-13 : f32
    %390 = vector.broadcast %cst_168 : f32 to vector<2x1xf32>
    %391 = arith.addf %389, %390 : vector<2x1xf32>
    %392 = math.rsqrt %391 : vector<2x1xf32>
    %393 = vector.broadcast %392 : vector<2x1xf32> to vector<2x32xf32>
    %394 = arith.mulf %386, %393 : vector<2x32xf32>
    %c0_169 = arith.constant 0 : index
    %c0_170 = arith.constant 0 : index
    %395 = vector.load %arg21[%c0_169, %c0_170] : memref<32x128xf32, #tpu.memory_space<vmem>>, vector<32x128xf32>
    %cst_171 = arith.constant dense<0.000000e+00> : vector<2x128xf32>
    %396 = tpu.matmul %394, %395, %cst_171 {dimension_numbers = #tpu.dot_dimension_numbers<[1], [0], [0], [1], [0, 0, 1, 1], [], []>} : vector<2x32xf32>, vector<32x128xf32>, vector<2x128xf32> -> vector<2x128xf32>
    %cst_172 = arith.constant 1.000000e+02 : f32
    %397 = vector.broadcast %cst_172 : f32 to vector<2x128xf32>
    %398 = arith.mulf %397, %396 : vector<2x128xf32>
    %c0_173 = arith.constant 0 : index
    %c0_174 = arith.constant 0 : index
    %399 = vector.load %arg22[%c0_173, %c0_174] : memref<2x128xf32, #tpu.memory_space<vmem>>, vector<2x128xf32>
    tpu.vector_store %arg22[%c0_173, %c0_174], %398 {strides = array<i32>} : memref<2x128xf32, #tpu.memory_space<vmem>>, vector<2x128xf32>,
    return
  }
}

</mosaic_0001>

<bundles_post_ra>
// kernel: tile.9
= control target key start
LH: loop header
LB: loop body
LE: loop exit
PB: predicated region body
PF: predicated region fallthrough
CT: control target
= control target key end

     0   :  { %vm3_vm0 = vcmask 261120   ;;  %s34_s0 = inlined_call_operand.vmem [shape: f32[2,5,32], index: 0, kind: input, shape index: {}]   ;;  %s35_s1 = inlined_call_operand.vmem [shape: f32[10,32], index: 1, kind: output, shape index: {}]  }
   0x1   :  { %v2_v0 = vld [vmem:[%s34_s0] sm:$0x1f]   ;;  %v10_v1 = vld [vmem:[%s34_s0 + $0x8] sm:$0x1f]  }
   0x2   :  { %4 = vst.msk [vmem:[%s35_s1] sm:$0x1f] %vm3_vm0, %v2_v0   ;;  %11 = vst.msk [vmem:[%s35_s1 + $0x5] sm:$0x1f] %vm3_vm0, %v10_v1  }

// kernel: forward.1
= control target key start
LH: loop header
LB: loop body
LE: loop exit
PB: predicated region body
PF: predicated region fallthrough
CT: control target
= control target key end

     0   :  { %s4689_s0 = inlined_call_operand.vmem [shape: f32[10,192], index: 0, kind: input, shape index: {}]   ;;  %s4690_s1 = inlined_call_operand.vmem [shape: f32[10,32], index: 1, kind: input, shape index: {}]   ;;  %s4691_s2 = inlined_call_operand.vmem [shape: f32[10,10], index: 2, kind: input, shape index: {}]   ;;  %s4692_s3 = inlined_call_operand.vmem [shape: f32[192,32], index: 3, kind: input, shape index: {}]   ;;  %s4693_s4 = inlined_call_operand.vmem [shape: f32[1,32], index: 4, kind: input, shape index: {}]   ;;  %s4694_s5 = inlined_call_operand.vmem [shape: f32[1,32], index: 5, kind: input, shape index: {}]   ;;  %s4695_s6 = inlined_call_operand.vmem [shape: f32[2,1,32], index: 6, kind: input, shape index: {}]   ;;  %s4696_s7 = inlined_call_operand.vmem [shape: f32[2,1,32], index: 7, kind: input, shape index: {}]   ;;  %s4697_s8 = inlined_call_operand.vmem [shape: f32[2,32,96], index: 8, kind: input, shape index: {}]   ;;  %s4698_s9 = inlined_call_operand.vmem [shape: f32[2,1,96], index: 9, kind: input, shape index: {}]   ;;  %s4699_s10 = inlined_call_operand.vmem [shape: f32[2,32,32], index: 10, kind: input, shape index: {}]   ;;  %s4700_s11 = inlined_call_operand.vmem [shape: f32[2,1,32], index: 11, kind: input, shape index: {}]   ;;  %s4701_s12 = inlined_call_operand.vmem [shape: f32[2,1,32], index: 12, kind: input, shape index: {}]   ;;  %s4702_s13 = inlined_call_operand.vmem [shape: f32[2,1,32], index: 13, kind: input, shape index: {}]   ;;  %s4703_s14 = inlined_call_operand.vmem [shape: f32[2,32,128], index: 14, kind: input, shape index: {}]   ;;  %s4704_s15 = inlined_call_operand.vmem [shape: f32[2,1,128], index: 15, kind: input, shape index: {}]   ;;  %s4705_s16 = inlined_call_operand.vmem [shape: f32[2,128,32], index: 16, kind: input, shape index: {}]   ;;  %s4706_s17 = inlined_call_operand.vmem [shape: f32[2,1,32], index: 17, kind: input, shape index: {}]   ;;  %s4707_s18 = inlined_call_operand.vmem [shape: f32[1,32], index: 18, kind: input, shape index: {}]   ;;  %s4708_s19 = inlined_call_operand.vmem [shape: f32[1,32], index: 19, kind: input, shape index: {}]   ;;  %s4709_s20 = inlined_call_operand.vmem [shape: f32[32,32], index: 20, kind: input, shape index: {}]   ;;  %s4710_s21 = inlined_call_operand.vmem [shape: f32[32,128], index: 21, kind: input, shape index: {}]   ;;  %s4711_s22 = inlined_call_operand.hbm [shape: f32[2,128], index: 22, kind: output, shape index: {}]  }
   0x1   :  { %4735 = sst [smem:[#allocation5_spill]] %s4689_s0 }
   0x2   :  { %4736 = sst [smem:[#allocation6_spill]] %s4690_s1 }
   0x3   :  { %4737 = sst [smem:[#allocation7_spill]] %s4691_s2 }
   0x4   :  { %4738 = sst [smem:[#allocation8_spill]] %s4692_s3 }
   0x5   :  { %4739 = sst [smem:[#allocation9_spill]] %s4693_s4 }
   0x6   :  { %4740 = sst [smem:[#allocation10_spill]] %s4694_s5 }
   0x7   :  { %4741 = sst [smem:[#allocation11_spill]] %s4695_s6 }
   0x8   :  { %s4742_s29 = sld [smem:[#allocation8_spill]]  ;;  %v3798_v1 = vmov 0.0   ;;  %vm102_vm0 = vcmask 523264  }
   0x9   :  { %109 = vmatprep.subr.mxu0 %v3798_v1  ;;  %s4743_s2 = sld [smem:[#allocation5_spill]] }
   0xe   :  { %v91_v0 = vld [vmem:[%s4742_s29 + $0x78] sm:$0xff]  ;;  %v90_v2 = vld [vmem:[%s4742_s29 + $0x70] sm:$0xff]  ;;  %v89_v3 = vld [vmem:[%s4742_s29 + $0x68] sm:$0xff] }
   0xf   :  { %110 = vmatpush1.msra.mxu0 %v91_v0  ;;  %v88_v4 = vld [vmem:[%s4742_s29 + $0x60] sm:$0xff]  ;;  %v87_v5 = vld [vmem:[%s4742_s29 + $0x58] sm:$0xff]  ;;  %v73_v6 = vld [vmem:[%s4743_s2 + $0x8] sm:$0xff] }
  0x10   :  { %111 = vmatprep.subr.mxu0 %v3798_v1  ;;  %v86_v7 = vld [vmem:[%s4742_s29 + $0x50] sm:$0xff]  ;;  %3117 = vmatprep.mubr.msk.f32.mxu0 %vm102_vm0, %v73_v6 }
  0x11   :  { %112 = vmatpush1.msra.mxu0 %v90_v2 }
  0x12   :  { %113 = vmatprep.subr.mxu0 %v3798_v1 }
  0x13   :  { %114 = vmatpush1.msra.mxu0 %v89_v3 }
  0x14   :  { %115 = vmatprep.subr.mxu0 %v3798_v1 }
  0x15   :  { %116 = vmatpush1.msra.mxu0 %v88_v4 }
  0x16   :  { %117 = vmatprep.subr.mxu0 %v3798_v1 }
  0x17   :  { %27 = vsyncpa [#allocation3], 0  ;;  %118 = vmatpush1.msra.mxu0 %v87_v5  ;;  %v85_v8 = vld [vmem:[%s4742_s29 + $0x48] sm:$0xff]  ;;  %v84_v9 = vld [vmem:[%s4742_s29 + $0x40] sm:$0xff]  ;;  %s4744_s23 = sld [smem:[#allocation6_spill]]  ;;  %vm186_vm1 = vcmask 261120  }
  0x18   :  { %119 = vmatprep.subr.mxu0 %v3798_v1  ;;  %v83_v10 = vld [vmem:[%s4742_s29 + $0x38] sm:$0xff]  ;;  %v82_v11 = vld [vmem:[%s4742_s29 + $0x30] sm:$0xff]  ;;  %v81_v12 = vld [vmem:[%s4742_s29 + $0x28] sm:$0xff]  ;;  %vm190_vm2 = vcmask 254976   ;;  %s4745_s6 = sld [smem:[#allocation9_spill]]  ;;  %vm382_vm3 = vcmask 64512  }
  0x19   :  { %120 = vmatpush1.msra.mxu0 %v86_v7  ;;  %v80_v13 = vld [vmem:[%s4742_s29 + $0x20] sm:$0xff]  ;;  %v79_v14 = vld [vmem:[%s4742_s29 + $0x18] sm:$0xff]  ;;  %v78_v15 = vld [vmem:[%s4742_s29 + $0x10] sm:$0xff]  ;;  %s4746_s27 = sld [smem:[#allocation10_spill]]  ;;  %s3799_s3 = smov 96   ;;  %vm470_vm4 = vcmask 74752  }
  0x1a   :  { %121 = vmatprep.subr.mxu0 %v3798_v1  ;;  %v77_v16 = vld [vmem:[%s4742_s29 + $0x8] sm:$0xff]  ;;  %v76_v17 = vld [vmem:[%s4742_s29] sm:$0xff]  ;;  %v99_v18 = vld [vmem:[%s4742_s29 + $0xb8] sm:$0xff]  ;;  %s4747_s24 = sld [smem:[#allocation11_spill]]  ;;  %vm466_vm5 = vcmask 80896   ;;  %s3801_s1 = smov 88  }
  0x1b   :  { %122 = vmatpush1.msra.mxu0 %v85_v8  ;;  %v98_v19 = vld [vmem:[%s4742_s29 + $0xb0] sm:$0xff]  ;;  %v97_v20 = vld [vmem:[%s4742_s29 + $0xa8] sm:$0xff]  ;;  %v96_v21 = vld [vmem:[%s4742_s29 + $0xa0] sm:$0xff]  ;;  %s4748_s4 = sld [smem:[#allocation7_spill]]  ;;  %s3802_s5 = smov 120   ;;  %vm501_vm6 = vcmask 1041408  }
  0x1c   :  { %123 = vmatprep.subr.mxu0 %v3798_v1  ;;  %v95_v22 = vld [vmem:[%s4742_s29 + $0x98] sm:$0xff]  ;;  %v94_v23 = vld [vmem:[%s4742_s29 + $0x90] sm:$0xff]  ;;  %v93_v24 = vld [vmem:[%s4742_s29 + $0x88] sm:$0xff]  ;;  %s4731_s25 = smov 112   ;;  %s4727_s26 = smov 48   ;;  %vm1208_vm7 = vcmask 130048  }
  0x1d   :  { %124 = vmatpush1.msra.mxu0 %v84_v9  ;;  %v92_v25 = vld [vmem:[%s4742_s29 + $0x80] sm:$0xff]  ;;  %v75_v27 = vld [vmem:[%s4743_s2 + $0x18] sm:$0x3]  ;;  %v74_v28 = vld [vmem:[%s4743_s2 + $0x10] sm:$0x3]  ;;  %s4723_s28 = smov 104  }
  0x1e   :  { %125 = vmatprep.subr.mxu0 %v3798_v1  ;;  %v72_v26 = vld [vmem:[%s4743_s2] sm:$0xff]  ;;  %v101_v33 = vld [vmem:[%s4744_s23 + $0x8] sm:$0x3]  ;;  %s4729_s2 = smov 56   ;;  %s4721_s30 = smov 40   ;;  %vm1211_vm8 = vcmask 195584  }
  0x1f   :  { %126 = vmatpush1.msra.mxu0 %v83_v10  ;;  %v100_v29 = vld [vmem:[%s4744_s23] sm:$0xff]  ;;  %s3800_s23 = smov 64   ;;  %s4719_s29 = smov 8   ;;  %vm2907_vm9 = vcmask 1040384   ;;  %vm3813_vm10 = vmmov 0  }
  0x20   :  { %127 = vmatprep.subr.mxu0 %v3798_v1  ;;  %v3119_v59 = vld [vmem:[%s4745_s6] ss:$0 sm:$0xff]  ;;  %s3804_s6 = smov 80   ;;  %s4717_s0 = smov 16  }
  0x21   :  { %128 = vmatpush1.msra.mxu0 %v82_v11  ;;  %v3120_v61 = vld [vmem:[%s4746_s27] ss:$0 sm:$0xff]  ;;  %s4725_s27 = smov 72  }
  0x22   :  { %129 = vmatprep.subr.mxu0 %v3798_v1 }
  0x23   :  { %130 = vmatpush1.msra.mxu0 %v81_v12  ;;  %v287_v12 = vld [vmem:[%s4697_s8 + $0x18] sm:$0xff] }
  0x24   :  { %131 = vmatprep.subr.mxu0 %v3798_v1 }
  0x25   :  { %132 = vmatpush1.msra.mxu0 %v80_v13  ;;  %v286_v13 = vld [vmem:[%s4697_s8 + $0x10] sm:$0xff] }
  0x26   :  { %133 = vmatprep.subr.mxu0 %v3798_v1 }
  0x27   :  { %134 = vmatpush1.msra.mxu0 %v79_v14  ;;  %v285_v14 = vld [vmem:[%s4697_s8 + $0x8] sm:$0xff] }
  0x28   :  { %135 = vmatprep.subr.mxu0 %v3798_v1 }
  0x29   :  { %136 = vmatpush1.msra.mxu0 %v78_v15  ;;  %v284_v15 = vld [vmem:[%s4697_s8] sm:$0xff] }
  0x2a   :  { %137 = vmatprep.subr.mxu0 %v3798_v1 }
  0x2b   :  { %138 = vmatpush1.msra.mxu0 %v77_v16 }
  0x2c   :  { %139 = vmatprep.subr.mxu0 %v3798_v1 }
  0x2d   :  { %140 = vmatpush1.msra.mxu0 %v76_v17 }
  0x2e   :  { %157 = vmatprep.subr.mxu0 %v3798_v1 }
  0x2f   :  { %158 = vmatpush2.msra.mxu0 %v99_v18 }
  0x30   :  { %159 = vmatprep.subr.mxu0 %v3798_v1 }
  0x31   :  { %160 = vmatpush2.msra.mxu0 %v98_v19 }
  0x32   :  { %161 = vmatprep.subr.mxu0 %v3798_v1 }
  0x33   :  { %162 = vmatpush2.msra.mxu0 %v97_v20 }
  0x34   :  { %163 = vmatprep.subr.mxu0 %v3798_v1 }
  0x35   :  { %164 = vmatpush2.msra.mxu0 %v96_v21 }
  0x36   :  { %165 = vmatprep.subr.mxu0 %v3798_v1 }
  0x37   :  { %166 = vmatpush2.msra.mxu0 %v95_v22 }
  0x38   :  { %167 = vmatprep.subr.mxu0 %v3798_v1 }
  0x39   :  { %168 = vmatpush2.msra.mxu0 %v94_v23 }
  0x3a   :  { %169 = vmatprep.subr.mxu0 %v3798_v1 }
  0x3b   :  { %170 = vmatpush2.msra.mxu0 %v93_v24 }
  0x3c   :  { %171 = vmatprep.subr.mxu0 %v3798_v1 }
  0x3d   :  { %172 = vmatpush2.msra.mxu0 %v92_v25 }
  0x3e   :  { %174 = vmatmul.mubr.f32.vlgmr.msra.gmra.mxu0 %v72_v26  ;;  %3391 = vmatprep.subr.mxu0 %v287_v12 }
  0x3f   :  { %3118 = vmatprep.mubr.msk.f32.mxu0 %vm102_vm0, %v75_v27  ;;  %3392 = vmatpush3.msra.mxu0 %v287_v12 }
  0x40   :  { %3393 = vmatprep.subr.mxu0 %v286_v13 }
  0x41   :  { %3394 = vmatpush3.msra.mxu0 %v286_v13 }
  0x42   :  { %179 = vmatmul.mubr.f32.gmra.mxu0 %v74_v28  ;;  %3395 = vmatprep.subr.mxu0 %v285_v14 }
  0x43   :  { %3396 = vmatpush3.msra.mxu0 %v285_v14 }
  0x44   :  { %3397 = vmatprep.subr.mxu0 %v284_v15 }
  0x45   :  { %3398 = vmatpush3.msra.mxu0 %v284_v15 }
  0xfe   :  { %v175_v30 = vpop.f32.mrf.mxu0 }
  0xff   :  { %v176_v31 = vadd.f32 %v175_v30, %v100_v29 }
 0x100   :  { %v177_v32 = vpop.f32.mrf.mxu0 }
 0x101   :  { %v187_v34 = vsel %vm186_vm1, %v176_v31, 0.0  ;;  %v194_v35 = vmul.f32 %v176_v31, %v176_v31  ;;  %v3121_v32 = vld [vmem:[%s4747_s24] ss:$0 sm:$0xff] }
 0x102   :  { %v180_v36 = vpop.f32.mrf.mxu0  ;;  %188 = vadd.xlane.f32.xlu0 %v187_v34  ;;  %v3122_v34 = vld [vmem:[%s4696_s7] ss:$0 sm:$0xff] }
 0x103   :  { %v181_v37 = vadd.f32 %v180_v36, %v101_v33  ;;  %v196_v38 = vsel %vm186_vm1, %v194_v35, 0.0 }
 0x104   :  { %v182_v39 = vpop.f32.mrf.mxu0  ;;  %197 = vadd.xlane.f32.xlu1 %v196_v38 }
 0x105   :  { %v191_v40 = vsel %vm190_vm2, %v181_v37, 0.0  ;;  %v195_v41 = vmul.f32 %v181_v37, %v181_v37 }
 0x106   :  { %192 = vadd.xlane.f32.xlu0 %v191_v40 }
 0x107   :  { %v199_v42 = vsel %vm190_vm2, %v195_v41, 0.0 }
 0x108   :  { %200 = vadd.xlane.f32.xlu1 %v199_v42  ;;  %v3123_v42 = vld [vmem:[%s4698_s9] ss:$0 sm:$0xff] }
 0x18b   :  { %v189_v43 = vpop.xlane.xlu0 %188 }
 0x18c   :  { %v202_v44 = vmul.f32 0.03125, %v189_v43 }
 0x18d   :  { %v198_v45 = vpop.xlane.xlu1 %197 }
 0x18e   :  { %v206_v46 = vmul.f32 %v202_v44, %v202_v44  ;;  %v204_v47 = vmul.f32 0.03125, %v198_v45  ;;  %v210_v57 = vsub.f32 %v176_v31, %v202_v44 }
 0x18f   :  { %v193_v48 = vpop.xlane.xlu0 %192 }
 0x190   :  { %v208_v49 = vsub.f32 %v204_v47, %v206_v46  ;;  %v203_v50 = vmul.f32 0.03125, %v193_v48 }
 0x191   :  { %v201_v51 = vpop.xlane.xlu1 %200 }
 0x192   :  { %v212_v52 = vadd.f32 1e-05, %v208_v49  ;;  %v207_v53 = vmul.f32 %v203_v50, %v203_v50  ;;  %v205_v54 = vmul.f32 0.03125, %v201_v51  ;;  %v211_v62 = vsub.f32 %v181_v37, %v203_v50  ;;  %v4114_v49 = vld [vmem:[%s4748_s4 + $0x8] sm:$0x3]  ;;  %v4119_v51 = vld [vmem:[%s4748_s4] sm:$0xff] }
 0x194   :  { %3678 = vrsqrt.f32 %v212_v52  ;;  %v209_v55 = vsub.f32 %v205_v54, %v207_v53 }
 0x196   :  { %v213_v56 = vadd.f32 1e-05, %v209_v55 }
 0x198   :  { %3680 = vrsqrt.f32 %v213_v56 }
 0x1a1   :  { %v3679_v58 = vpop.eup %3678 }
 0x1a2   :  { %v216_v60 = vmul.f32 %v3679_v58, %v210_v57 }
 0x1a4   :  { %v224_v63 = vmul.f32 %v3119_v59, %v216_v60 }
 0x1a5   :  { %v3681_v0 = vpop.eup %3680 }
 0x1a6   :  { %v4056_v2 = vadd.f32 %v3120_v61, %v224_v63  ;;  %v217_v3 = vmul.f32 %v3681_v0, %v211_v62 }
 0x1a8   :  { %v238_v4 = vsel %vm186_vm1, %v4056_v2, 0.0  ;;  %v244_v5 = vmul.f32 %v4056_v2, %v4056_v2  ;;  %v225_v6 = vmul.f32 %v3119_v59, %v217_v3 }
 0x1a9   :  { %239 = vadd.xlane.f32.xlu0 %v238_v4 }
 0x1aa   :  { %v4062_v7 = vadd.f32 %v3120_v61, %v225_v6  ;;  %v246_v8 = vsel %vm186_vm1, %v244_v5, 0.0 }
 0x1ac   :  { %v241_v9 = vsel %vm190_vm2, %v4062_v7, 0.0  ;;  %v245_v10 = vmul.f32 %v4062_v7, %v4062_v7 }
 0x1ad   :  { %247 = vadd.xlane.f32.xlu0 %v246_v8  ;;  %242 = vadd.xlane.f32.xlu1 %v241_v9 }
 0x1ae   :  { %v249_v11 = vsel %vm190_vm2, %v245_v10, 0.0 }
 0x1b1   :  { %250 = vadd.xlane.f32.xlu1 %v249_v11 }
 0x232   :  { %v240_v16 = vpop.xlane.xlu0 %239 }
 0x233   :  { %v252_v17 = vmul.f32 0.03125, %v240_v16 }
 0x235   :  { %v256_v20 = vmul.f32 %v252_v17, %v252_v17  ;;  %v260_v30 = vsub.f32 %v4056_v2, %v252_v17 }
 0x236   :  { %v243_v18 = vpop.xlane.xlu1 %242  ;;  %v248_v19 = vpop.xlane.xlu0 %247 }
 0x237   :  { %v253_v21 = vmul.f32 0.03125, %v243_v18  ;;  %v254_v22 = vmul.f32 0.03125, %v248_v19 }
 0x239   :  { %v258_v23 = vsub.f32 %v254_v22, %v256_v20  ;;  %v257_v25 = vmul.f32 %v253_v21, %v253_v21  ;;  %v261_v35 = vsub.f32 %v4062_v7, %v253_v21 }
 0x23a   :  { %v251_v24 = vpop.xlane.xlu1 %250 }
 0x23b   :  { %v262_v26 = vadd.f32 1e-05, %v258_v23  ;;  %v255_v27 = vmul.f32 0.03125, %v251_v24 }
 0x23d   :  { %3682 = vrsqrt.f32 %v262_v26  ;;  %v259_v28 = vsub.f32 %v255_v27, %v257_v25 }
 0x23f   :  { %v263_v29 = vadd.f32 1e-05, %v259_v28 }
 0x241   :  { %3684 = vrsqrt.f32 %v263_v29 }
 0x24a   :  { %v3683_v31 = vpop.eup %3682 }
 0x24b   :  { %v266_v33 = vmul.f32 %v3683_v31, %v260_v30 }
 0x24d   :  { %v274_v36 = vmul.f32 %v3121_v32, %v266_v33 }
 0x24e   :  { %v3685_v37 = vpop.eup %3684 }
 0x24f   :  { %v267_v38 = vmul.f32 %v3685_v37, %v261_v35  ;;  %v282_v39 = vadd.f32 %v3122_v34, %v274_v36 }
 0x251   :  { %v275_v40 = vmul.f32 %v3121_v32, %v267_v38  ;;  %3399 = vmatprep.mubr.msk.f32.mxu0 %vm186_vm1, %v282_v39 }
 0x253   :  { %v283_v41 = vadd.f32 %v3122_v34, %v275_v40 }
 0x255   :  { %3400 = vmatmul.mubr.msk.f32.vlgmr.msra.gmra.mxu0 %vm186_vm1, %v283_v41 }
 0x315   :  { %v3401_v43 = vpop.f32.mrf.mxu0 }
 0x316   :  { %v4095_v44 = vadd.f32 %v3401_v43, %v3123_v42 }
 0x317   :  { %v367_v45 = vpop.f32.mrf.mxu0 }
 0x318   :  { %v4097_v46 = vadd.f32 %v3123_v42, %v367_v45  ;;  %380 = vrot.lane.b32.xlu0 %v4095_v44, %s3799_s3 }
 0x31a   :  { %378 = vrot.lane.b32.xlu1 %v4097_v46, %s3799_s3  ;;  %3406 = vmatprep.mubr.msk.f32.mxu1 %vm382_vm3, %v4097_v46 }
 0x38a   :  { %v381_v47 = vpop.permute.xlu0 %380 }
 0x38b   :  { %3402 = vmatprep.subr.msk.mxu1 %vm382_vm3, %v381_v47 }
 0x38c   :  { %3403 = vmatpush3.xpose.msk.msra.mxu1 %vm382_vm3, %v381_v47  ;;  %v379_v48 = vpop.permute.xlu1 %378 }
 0x38d   :  { %3404 = vmatprep.subr.msk.mxu1 %vm382_vm3, %v379_v48 }
 0x390   :  { %3405 = vmatpush3.xpose.msk.msra.mxu1 %vm382_vm3, %v379_v48 }
 0x393   :  { %3407 = vmatmul.mubr.msk.f32.vlgmr.msra.gmra.mxu1 %vm382_vm3, %v4095_v44 }
 0x453   :  { %v3408_v50 = vpop.f32.mrf.mxu1 }
 0x454   :  { %v463_v52 = vadd.f32 %v3408_v50, %v4114_v49 }
 0x455   :  { %v457_v53 = vpop.f32.mrf.mxu1 }
 0x456   :  { %v458_v54 = vadd.f32 %v457_v53, %v4119_v51  ;;  %v471_v55 = vsel %vm470_vm4, %v463_v52, -inf }
 0x457   :  { %472 = vmax.xlane.f32.xlu0 %v471_v55 }
 0x458   :  { %v467_v56 = vsel %vm466_vm5, %v458_v54, -inf }
 0x459   :  { %468 = vmax.xlane.f32.xlu1 %v467_v56 }
 0x4e0   :  { %v473_v57 = vpop.xlane.xlu0 %472 }
 0x4e1   :  { %v475_v58 = vsub.f32 %v463_v52, %v473_v57 }
 0x4e2   :  { %v469_v59 = vpop.xlane.xlu1 %468 }
 0x4e3   :  { %v478_v60 = vmul.f32 1.442695, %v475_v58  ;;  %v474_v61 = vsub.f32 %v458_v54, %v469_v59 }
 0x4e5   :  { %3686 = vpow2.f32 %v478_v60  ;;  %v476_v62 = vmul.f32 1.442695, %v474_v61 }
 0x4e7   :  { %3688 = vpow2.f32 %v476_v62 }
 0x4f2   :  { %v3687_v63 = vpop.eup %3686 }
 0x4f3   :  { %v483_v0 = vsel %vm470_vm4, %v3687_v63, 0.0 }
 0x4f4   :  { %v3689_v3 = vpop.eup %3688  ;;  %484 = vadd.xlane.f32.xlu1 %v483_v0 }
 0x4f5   :  { %v480_v4 = vsel %vm466_vm5, %v3689_v3, 0.0 }
 0x4f6   :  { %481 = vadd.xlane.f32.xlu0 %v480_v4 }
 0x505   :  { %490 = vrot.lane.b32.xlu1 %v4097_v46, %s3800_s23 }
 0x509   :  { %585 = vrot.lane.b32.xlu1 %v4095_v44, %s3801_s1 }
 0x50c   :  { %492 = vrot.lane.b32.xlu0 %v4095_v44, %s3800_s23 }
 0x50d   :  { %583 = vrot.lane.b32.xlu1 %v4097_v46, %s3801_s1 }
 0x510   :  { %579 = vrot.lane.b32.xlu0 %v4097_v46, %s3802_s5 }
 0x511   :  { %581 = vrot.lane.b32.xlu1 %v4095_v44, %s3802_s5 }
 0x57d   :  { %v485_v5 = vpop.xlane.xlu1 %484 }
 0x57e   :  { %3690 = vrcp.f32 %v485_v5 }
 0x57f   :  { %v482_v6 = vpop.xlane.xlu0 %481 }
 0x580   :  { %3692 = vrcp.f32 %v482_v6 }
 0x581   :  { %v491_v8 = vpop.permute.xlu1 %490 }
 0x583   :  { %v493_v9 = vpop.permute.xlu0 %492 }
 0x584   :  { %3409 = vmatprep.subr.msk.mxu1 %vm501_vm6, %v493_v9 }
 0x585   :  { %3410 = vmatpush3.msk.msra.mxu1 %vm501_vm6, %v493_v9  ;;  %v586_v10 = vpop.permute.xlu1 %585 }
 0x586   :  { %3411 = vmatprep.subr.mxu1 %v491_v8 }
 0x587   :  { %3412 = vmatpush3.msra.mxu1 %v491_v8  ;;  %v580_v15 = vpop.permute.xlu0 %579 }
 0x588   :  { %3416 = vmatprep.subr.msk.mxu1 %vm382_vm3, %v586_v10 }
 0x589   :  { %v584_v16 = vpop.permute.xlu1 %583 }
 0x58b   :  { %v3691_v11 = vpop.eup %3690 }
 0x58c   :  { %v489_v14 = vmul.f32 %v3691_v11, %v3687_v63 }
 0x58d   :  { %v3693_v12 = vpop.eup %3692  ;;  %v582_v17 = vpop.permute.xlu1 %581 }
 0x58e   :  { %v488_v13 = vmul.f32 %v3693_v12, %v3689_v3 }
 0x590   :  { %3413 = vmatprep.mubr.msk.f32.mxu1 %vm466_vm5, %v488_v13 }
 0x591   :  { %3414 = vmatmul.mubr.msk.f32.vlgmr.msra.gmra.mxu1 %vm466_vm5, %v489_v14 }
 0x592   :  { %3417 = vmatpush3.xpose.msk.msra.mxu1 %vm382_vm3, %v586_v10  ;;  %3420 = vmatprep.mubr.msk.f32.mxu1 %vm382_vm3, %v580_v15 }
 0x593   :  { %3418 = vmatprep.subr.msk.mxu1 %vm382_vm3, %v584_v16 }
 0x596   :  { %3419 = vmatpush3.xpose.msk.msra.mxu1 %vm382_vm3, %v584_v16 }
 0x599   :  { %3421 = vmatmul.mubr.msk.f32.vlgmr.msra.gmra.mxu1 %vm382_vm3, %v582_v17 }
 0x651   :  { %v4149_v18 = vpop.f32.mrf.mxu1 }
 0x653   :  { %v4151_v19 = vpop.f32.mrf.mxu1 }
 0x659   :  { %v3422_v20 = vpop.f32.mrf.mxu1 }
 0x65a   :  { %v667_v21 = vadd.f32 %v3422_v20, %v4114_v49 }
 0x65b   :  { %v661_v22 = vpop.f32.mrf.mxu1 }
 0x65c   :  { %v662_v23 = vadd.f32 %v661_v22, %v4119_v51  ;;  %v673_v24 = vsel %vm470_vm4, %v667_v21, -inf }
 0x65d   :  { %674 = vmax.xlane.f32.xlu1 %v673_v24 }
 0x65e   :  { %v670_v25 = vsel %vm466_vm5, %v662_v23, -inf }
 0x65f   :  { %671 = vmax.xlane.f32.xlu0 %v670_v25 }
 0x66e   :  { %692 = vrot.lane.b32.xlu1 %v4097_v46, %s4729_s2 }
 0x672   :  { %786 = vrot.lane.b32.xlu1 %v4095_v44, %s3804_s6 }
 0x676   :  { %784 = vrot.lane.b32.xlu1 %v4097_v46, %s3804_s6 }
 0x67a   :  { %782 = vrot.lane.b32.xlu1 %v4095_v44, %s4731_s25 }
 0x6e6   :  { %v675_v26 = vpop.xlane.xlu1 %674 }
 0x6e7   :  { %v677_v27 = vsub.f32 %v667_v21, %v675_v26 }
 0x6e8   :  { %v672_v28 = vpop.xlane.xlu0 %671 }
 0x6e9   :  { %v680_v29 = vmul.f32 1.442695, %v677_v27  ;;  %v676_v30 = vsub.f32 %v662_v23, %v672_v28 }
 0x6ea   :  { %v693_v38 = vpop.permute.xlu1 %692 }
 0x6eb   :  { %3694 = vpow2.f32 %v680_v29  ;;  %v678_v31 = vmul.f32 1.442695, %v676_v30 }
 0x6ed   :  { %3696 = vpow2.f32 %v678_v31 }
 0x6ee   :  { %v787_v40 = vpop.permute.xlu1 %786 }
 0x6f2   :  { %v785_v48 = vpop.permute.xlu1 %784 }
 0x6f6   :  { %v783_v50 = vpop.permute.xlu1 %782 }
 0x6f8   :  { %v3695_v32 = vpop.eup %3694 }
 0x6f9   :  { %v685_v33 = vsel %vm470_vm4, %v3695_v32, 0.0 }
 0x6fa   :  { %v3697_v34 = vpop.eup %3696  ;;  %686 = vadd.xlane.f32.xlu0 %v685_v33 }
 0x6fb   :  { %v682_v35 = vsel %vm466_vm5, %v3697_v34, 0.0 }
 0x6fe   :  { %683 = vadd.xlane.f32.xlu0 %v682_v35 }
 0x714   :  { %694 = vrot.lane.b32.xlu0 %v4095_v44, %s4729_s2  ;;  %s4755_s2 = smov 8  }
 0x718   :  { %780 = vrot.lane.b32.xlu0 %v4097_v46, %s4731_s25  ;;  %s4756_s25 = smov 16  }
 0x783   :  { %v687_v36 = vpop.xlane.xlu0 %686 }
 0x784   :  { %3698 = vrcp.f32 %v687_v36 }
 0x787   :  { %v684_v37 = vpop.xlane.xlu0 %683 }
 0x788   :  { %3700 = vrcp.f32 %v684_v37 }
 0x78b   :  { %v695_v39 = vpop.permute.xlu0 %694 }
 0x78c   :  { %3423 = vmatprep.subr.msk.mxu1 %vm501_vm6, %v695_v39 }
 0x78d   :  { %3424 = vmatpush3.msk.msra.mxu1 %vm501_vm6, %v695_v39 }
 0x78e   :  { %3425 = vmatprep.subr.mxu1 %v693_v38 }
 0x78f   :  { %3426 = vmatpush3.msra.mxu1 %v693_v38  ;;  %v781_v47 = vpop.permute.xlu0 %780 }
 0x790   :  { %3430 = vmatprep.subr.msk.mxu1 %vm382_vm3, %v787_v40 }
 0x791   :  { %v3699_v41 = vpop.eup %3698 }
 0x792   :  { %v691_v45 = vmul.f32 %v3699_v41, %v3695_v32 }
 0x795   :  { %v3701_v42 = vpop.eup %3700 }
 0x796   :  { %v690_v43 = vmul.f32 %v3701_v42, %v3697_v34 }
 0x798   :  { %3427 = vmatprep.mubr.msk.f32.mxu1 %vm466_vm5, %v690_v43 }
 0x799   :  { %3428 = vmatmul.mubr.msk.f32.vlgmr.msra.gmra.mxu1 %vm466_vm5, %v691_v45 }
 0x79a   :  { %3431 = vmatpush3.xpose.msk.msra.mxu1 %vm382_vm3, %v787_v40  ;;  %3434 = vmatprep.mubr.msk.f32.mxu1 %vm382_vm3, %v781_v47 }
 0x79b   :  { %3432 = vmatprep.subr.msk.mxu1 %vm382_vm3, %v785_v48 }
 0x79e   :  { %3433 = vmatpush3.xpose.msk.msra.mxu1 %vm382_vm3, %v785_v48 }
 0x7a1   :  { %3435 = vmatmul.mubr.msk.f32.vlgmr.msra.gmra.mxu1 %vm382_vm3, %v783_v50 }
 0x859   :  { %v4181_v52 = vpop.f32.mrf.mxu1 }
 0x85b   :  { %v4183_v53 = vpop.f32.mrf.mxu1 }
 0x861   :  { %v3436_v54 = vpop.f32.mrf.mxu1 }
 0x862   :  { %v868_v55 = vadd.f32 %v3436_v54, %v4114_v49  ;;  %v1214_v54 = vld [vmem:[%s4699_s10] sm:$0xff] }
 0x863   :  { %v862_v56 = vpop.f32.mrf.mxu1 }
 0x864   :  { %v863_v57 = vadd.f32 %v862_v56, %v4119_v51  ;;  %v874_v58 = vsel %vm470_vm4, %v868_v55, -inf }
 0x865   :  { %875 = vmax.xlane.f32.xlu1 %v874_v58 }
 0x866   :  { %v871_v59 = vsel %vm466_vm5, %v863_v57, -inf }
 0x867   :  { %872 = vmax.xlane.f32.xlu0 %v871_v59 }
 0x876   :  { %893 = vrot.lane.b32.xlu1 %v4097_v46, %s4727_s26 }
 0x87a   :  { %987 = vrot.lane.b32.xlu1 %v4095_v44, %s4725_s27 }
 0x87e   :  { %985 = vrot.lane.b32.xlu1 %v4097_v46, %s4725_s27 }
 0x882   :  { %983 = vrot.lane.b32.xlu1 %v4095_v44, %s4723_s28 }
 0x8ee   :  { %v876_v60 = vpop.xlane.xlu1 %875 }
 0x8ef   :  { %v878_v61 = vsub.f32 %v868_v55, %v876_v60 }
 0x8f0   :  { %v873_v62 = vpop.xlane.xlu0 %872 }
 0x8f1   :  { %v881_v63 = vmul.f32 1.442695, %v878_v61  ;;  %v877_v0 = vsub.f32 %v863_v57, %v873_v62 }
 0x8f2   :  { %v894_v11 = vpop.permute.xlu1 %893 }
 0x8f3   :  { %3702 = vpow2.f32 %v881_v63  ;;  %v879_v3 = vmul.f32 1.442695, %v877_v0 }
 0x8f5   :  { %3704 = vpow2.f32 %v879_v3 }
 0x8f6   :  { %v988_v13 = vpop.permute.xlu1 %987 }
 0x8fa   :  { %v986_v21 = vpop.permute.xlu1 %985 }
 0x8fe   :  { %v984_v22 = vpop.permute.xlu1 %983 }
 0x900   :  { %v3703_v4 = vpop.eup %3702 }
 0x901   :  { %v886_v5 = vsel %vm470_vm4, %v3703_v4, 0.0 }
 0x902   :  { %v3705_v6 = vpop.eup %3704  ;;  %887 = vadd.xlane.f32.xlu0 %v886_v5 }
 0x903   :  { %v883_v8 = vsel %vm466_vm5, %v3705_v6, 0.0 }
 0x906   :  { %884 = vadd.xlane.f32.xlu0 %v883_v8 }
 0x91c   :  { %895 = vrot.lane.b32.xlu0 %v4095_v44, %s4727_s26 }
 0x920   :  { %981 = vrot.lane.b32.xlu0 %v4097_v46, %s4723_s28 }
 0x98b   :  { %v888_v9 = vpop.xlane.xlu0 %887 }
 0x98c   :  { %3706 = vrcp.f32 %v888_v9 }
 0x98f   :  { %v885_v10 = vpop.xlane.xlu0 %884 }
 0x990   :  { %3708 = vrcp.f32 %v885_v10 }
 0x993   :  { %v896_v12 = vpop.permute.xlu0 %895 }
 0x994   :  { %3437 = vmatprep.subr.msk.mxu1 %vm501_vm6, %v896_v12 }
 0x995   :  { %3438 = vmatpush3.msk.msra.mxu1 %vm501_vm6, %v896_v12 }
 0x996   :  { %3439 = vmatprep.subr.mxu1 %v894_v11 }
 0x997   :  { %3440 = vmatpush3.msra.mxu1 %v894_v11  ;;  %v982_v20 = vpop.permute.xlu0 %981 }
 0x998   :  { %3444 = vmatprep.subr.msk.mxu1 %vm382_vm3, %v988_v13 }
 0x999   :  { %v3707_v14 = vpop.eup %3706 }
 0x99a   :  { %v892_v17 = vmul.f32 %v3707_v14, %v3703_v4 }
 0x99d   :  { %v3709_v15 = vpop.eup %3708 }
 0x99e   :  { %v891_v16 = vmul.f32 %v3709_v15, %v3705_v6 }
 0x9a0   :  { %3441 = vmatprep.mubr.msk.f32.mxu1 %vm466_vm5, %v891_v16 }
 0x9a1   :  { %3442 = vmatmul.mubr.msk.f32.vlgmr.msra.gmra.mxu1 %vm466_vm5, %v892_v17  ;;  %v1361_v17 = vld [vmem:[%s4703_s14 + $0x18] sm:$0xff] }
 0x9a2   :  { %3445 = vmatpush3.xpose.msk.msra.mxu1 %vm382_vm3, %v988_v13  ;;  %3448 = vmatprep.mubr.msk.f32.mxu1 %vm382_vm3, %v982_v20  ;;  %v1360_v20 = vld [vmem:[%s4703_s14 + $0x10] sm:$0xff] }
 0x9a3   :  { %3446 = vmatprep.subr.msk.mxu1 %vm382_vm3, %v986_v21 }
 0x9a6   :  { %3447 = vmatpush3.xpose.msk.msra.mxu1 %vm382_vm3, %v986_v21  ;;  %v1359_v21 = vld [vmem:[%s4703_s14 + $0x8] sm:$0xff] }
 0x9a9   :  { %3449 = vmatmul.mubr.msk.f32.vlgmr.msra.gmra.mxu1 %vm382_vm3, %v984_v22  ;;  %v1358_v22 = vld [vmem:[%s4703_s14] sm:$0xff] }
 0xa61   :  { %v3443_v23 = vpop.f32.mrf.mxu1 }
 0xa63   :  { %v972_v24 = vpop.f32.mrf.mxu1 }
 0xa69   :  { %v3450_v25 = vpop.f32.mrf.mxu1 }
 0xa6a   :  { %v1069_v26 = vadd.f32 %v3450_v25, %v4114_v49 }
 0xa6b   :  { %v1063_v27 = vpop.f32.mrf.mxu1 }
 0xa6c   :  { %v1064_v28 = vadd.f32 %v1063_v27, %v4119_v51  ;;  %v1075_v29 = vsel %vm470_vm4, %v1069_v26, -inf }
 0xa6d   :  { %1076 = vmax.xlane.f32.xlu1 %v1075_v29 }
 0xa6e   :  { %v1072_v30 = vsel %vm466_vm5, %v1064_v28, -inf }
 0xa6f   :  { %1073 = vmax.xlane.f32.xlu0 %v1072_v30 }
 0xa7e   :  { %1094 = vrot.lane.b32.xlu1 %v4097_v46, %s4721_s30 }
 0xa82   :  { %1184 = vrot.lane.b32.xlu1 %v4183_v53, %s4719_s29  ;;  %v1215_v53 = vld [vmem:[%s4699_s10 + $0x8] sm:$0xff] }
 0xa86   :  { %1186 = vrot.lane.b32.xlu1 %v4181_v52, %s4719_s29  ;;  %v1216_v52 = vld [vmem:[%s4699_s10 + $0x10] sm:$0xff]  ;;  %s4733_s29 = smov 24  }
 0xa8a   :  { %1194 = vrot.lane.b32.xlu1 %v3443_v23, %s4717_s0 }
 0xaf6   :  { %v1077_v31 = vpop.xlane.xlu1 %1076 }
 0xaf7   :  { %v1079_v32 = vsub.f32 %v1069_v26, %v1077_v31 }
 0xaf8   :  { %v1074_v33 = vpop.xlane.xlu0 %1073 }
 0xaf9   :  { %v1082_v34 = vmul.f32 1.442695, %v1079_v32  ;;  %v1078_v35 = vsub.f32 %v1064_v28, %v1074_v33 }
 0xafa   :  { %v1095_v43 = vpop.permute.xlu1 %1094 }
 0xafb   :  { %3710 = vpow2.f32 %v1082_v34  ;;  %v1080_v36 = vmul.f32 1.442695, %v1078_v35 }
 0xafd   :  { %3712 = vpow2.f32 %v1080_v36 }
 0xafe   :  { %v1185_v57 = vpop.permute.xlu1 %1184 }
 0xaff   :  { %v1206_v61 = vsel %vm382_vm3, %v4151_v19, %v1185_v57  ;;  %v3156_v19 = vld [vmem:[%s4700_s11] ss:$0 sm:$0xff]  ;;  %v1477_v57 = vld [vmem:[%s4705_s16 + $0x48] sm:$0xff] }
 0xb02   :  { %v1187_v58 = vpop.permute.xlu1 %1186 }
 0xb03   :  { %v1207_v63 = vsel %vm382_vm3, %v4149_v18, %v1187_v58  ;;  %v1476_v58 = vld [vmem:[%s4705_s16 + $0x40] sm:$0xff] }
 0xb06   :  { %v1195_v59 = vpop.permute.xlu1 %1194 }
 0xb07   :  { %v1210_v4 = vsel %vm1208_vm7, %v1207_v63, %v1195_v59  ;;  %v1475_v59 = vld [vmem:[%s4705_s16 + $0x38] sm:$0xff] }
 0xb08   :  { %v3711_v37 = vpop.eup %3710  ;;  %v1471_v63 = vld [vmem:[%s4705_s16 + $0x18] sm:$0xff] }
 0xb09   :  { %v1087_v46 = vsel %vm470_vm4, %v3711_v37, 0.0 }
 0xb0a   :  { %v3713_v38 = vpop.eup %3712  ;;  %1088 = vadd.xlane.f32.xlu0 %v1087_v46 }
 0xb0b   :  { %v1084_v39 = vsel %vm466_vm5, %v3713_v38, 0.0 }
 0xb0e   :  { %1085 = vadd.xlane.f32.xlu0 %v1084_v39 }
 0xb24   :  { %1096 = vrot.lane.b32.xlu0 %v4095_v44, %s4721_s30  ;;  %v1217_v44 = vld [vmem:[%s4699_s10 + $0x18] sm:$0xff] }
 0xb25   :  { %3458 = vmatprep.subr.mxu1 %v1217_v44 }
 0xb26   :  { %3459 = vmatpush3.msra.mxu1 %v1217_v44  ;;  %v1483_v44 = vld [vmem:[%s4705_s16 + $0x78] sm:$0xff] }
 0xb27   :  { %3460 = vmatprep.subr.mxu1 %v1216_v52 }
 0xb28   :  { %1192 = vrot.lane.b32.xlu0 %v972_v24, %s4717_s0  ;;  %3461 = vmatpush3.msra.mxu1 %v1216_v52  ;;  %v1482_v52 = vld [vmem:[%s4705_s16 + $0x70] sm:$0xff]  ;;  %s4754_s0 = smov 40  }
 0xb29   :  { %3462 = vmatprep.subr.mxu1 %v1215_v53 }
 0xb2a   :  { %3463 = vmatpush3.msra.mxu1 %v1215_v53  ;;  %v1481_v53 = vld [vmem:[%s4705_s16 + $0x68] sm:$0xff] }
 0xb2b   :  { %3464 = vmatprep.subr.mxu1 %v1214_v54 }
 0xb2c   :  { %3465 = vmatpush3.msra.mxu1 %v1214_v54  ;;  %v1480_v54 = vld [vmem:[%s4705_s16 + $0x60] sm:$0xff] }
 0xb2d   :  { %3480 = vmatprep.subr.mxu1 %v1483_v44 }
 0xb93   :  { %v1089_v40 = vpop.xlane.xlu0 %1088 }
 0xb94   :  { %3714 = vrcp.f32 %v1089_v40  ;;  %v3158_v40 = vld [vmem:[%s4702_s13] ss:$0 sm:$0xff] }
 0xb97   :  { %v1086_v41 = vpop.xlane.xlu0 %1085 }
 0xb98   :  { %3716 = vrcp.f32 %v1086_v41 }
 0xb9b   :  { %v1097_v42 = vpop.permute.xlu0 %1096 }
 0xb9c   :  { %3451 = vmatprep.subr.msk.mxu0 %vm501_vm6, %v1097_v42 }
 0xb9d   :  { %3452 = vmatpush3.msk.msra.mxu0 %vm501_vm6, %v1097_v42 }
 0xb9e   :  { %3453 = vmatprep.subr.mxu0 %v1095_v43 }
 0xb9f   :  { %3454 = vmatpush3.msra.mxu0 %v1095_v43  ;;  %v1193_v60 = vpop.permute.xlu0 %1192 }
 0xba0   :  { %v1209_v0 = vsel %vm1208_vm7, %v1206_v61, %v1193_v60  ;;  %3469 = vmatprep.subr.mxu0 %v1361_v17  ;;  %v1474_v60 = vld [vmem:[%s4705_s16 + $0x30] sm:$0xff]  ;;  %v1473_v61 = vld [vmem:[%s4705_s16 + $0x28] sm:$0xff] }
 0xba1   :  { %v3715_v45 = vpop.eup %3714 }
 0xba2   :  { %v1093_v50 = vmul.f32 %v3715_v45, %v3711_v37 }
 0xba5   :  { %v3717_v47 = vpop.eup %3716 }
 0xba6   :  { %v1092_v48 = vmul.f32 %v3717_v47, %v3713_v38  ;;  %v3157_v38 = vld [vmem:[%s4701_s12] ss:$0 sm:$0xff] }
 0xba8   :  { %3455 = vmatprep.mubr.msk.f32.mxu0 %vm466_vm5, %v1092_v48 }
 0xba9   :  { %3456 = vmatmul.mubr.msk.f32.vlgmr.msra.gmra.mxu0 %vm466_vm5, %v1093_v50 }
 0xbaa   :  { %3470 = vmatpush3.msra.mxu0 %v1361_v17 }
 0xbab   :  { %3471 = vmatprep.subr.mxu0 %v1360_v20 }
 0xbac   :  { %3472 = vmatpush3.msra.mxu0 %v1360_v20 }
 0xbad   :  { %3473 = vmatprep.subr.mxu0 %v1359_v21 }
 0xbae   :  { %3474 = vmatpush3.msra.mxu0 %v1359_v21 }
 0xbaf   :  { %3475 = vmatprep.subr.mxu0 %v1358_v22 }
 0xbb0   :  { %3476 = vmatpush3.msra.mxu0 %v1358_v22 }
 0xc69   :  { %v3457_v55 = vpop.f32.mrf.mxu0 }
 0xc6a   :  { %1202 = vrot.lane.b32.xlu1 %v3457_v55, %s4733_s29  ;;  %v1479_v55 = vld [vmem:[%s4705_s16 + $0x58] sm:$0xff] }
 0xc6b   :  { %v1173_v56 = vpop.f32.mrf.mxu0 }
 0xc6c   :  { %1200 = vrot.lane.b32.xlu0 %v1173_v56, %s4733_s29  ;;  %v1478_v56 = vld [vmem:[%s4705_s16 + $0x50] sm:$0xff] }
 0xcdc   :  { %v1203_v62 = vpop.permute.xlu1 %1202 }
 0xcdd   :  { %v1213_v6 = vsel %vm1211_vm8, %v1210_v4, %v1203_v62  ;;  %v1472_v62 = vld [vmem:[%s4705_s16 + $0x20] sm:$0xff] }
 0xcde   :  { %v1201_v3 = vpop.permute.xlu0 %1200  ;;  %v1468_v4 = vld [vmem:[%s4705_s16] sm:$0xff] }
 0xcdf   :  { %v1212_v5 = vsel %vm1211_vm8, %v1209_v0, %v1201_v3  ;;  %v1470_v0 = vld [vmem:[%s4705_s16 + $0x10] sm:$0xff]  ;;  %v1469_v3 = vld [vmem:[%s4705_s16 + $0x8] sm:$0xff] }
 0xce0   :  { %3466 = vmatprep.mubr.msk.f32.mxu1 %vm186_vm1, %v1212_v5  ;;  %v3159_v5 = vld [vmem:[%s4704_s15] ss:$0 sm:$0xff] }
 0xce1   :  { %3467 = vmatmul.mubr.msk.f32.vlgmr.msra.gmra.mxu1 %vm186_vm1, %v1213_v6 }
 0xce2   :  { %3481 = vmatpush3.msra.mxu1 %v1483_v44 }
 0xce3   :  { %3482 = vmatprep.subr.mxu1 %v1482_v52 }
 0xce4   :  { %3483 = vmatpush3.msra.mxu1 %v1482_v52 }
 0xce5   :  { %3484 = vmatprep.subr.mxu1 %v1481_v53 }
 0xce6   :  { %3485 = vmatpush3.msra.mxu1 %v1481_v53 }
 0xce7   :  { %3486 = vmatprep.subr.mxu1 %v1480_v54 }
 0xce8   :  { %3487 = vmatpush3.msra.mxu1 %v1480_v54 }
 0xce9   :  { %3488 = vmatprep.subr.mxu1 %v1479_v55 }
 0xcea   :  { %3489 = vmatpush3.msra.mxu1 %v1479_v55 }
 0xceb   :  { %3490 = vmatprep.subr.mxu1 %v1478_v56 }
 0xcec   :  { %3491 = vmatpush3.msra.mxu1 %v1478_v56 }
 0xced   :  { %3492 = vmatprep.subr.mxu1 %v1477_v57 }
 0xcee   :  { %3493 = vmatpush3.msra.mxu1 %v1477_v57 }
 0xcef   :  { %3494 = vmatprep.subr.mxu1 %v1476_v58 }
 0xcf0   :  { %3495 = vmatpush3.msra.mxu1 %v1476_v58 }
 0xcf1   :  { %3496 = vmatprep.subr.mxu1 %v1475_v59 }
 0xcf2   :  { %3497 = vmatpush3.msra.mxu1 %v1475_v59 }
 0xcf3   :  { %3498 = vmatprep.subr.mxu1 %v1474_v60 }
 0xcf4   :  { %3499 = vmatpush3.msra.mxu1 %v1474_v60 }
 0xcf5   :  { %3500 = vmatprep.subr.mxu1 %v1473_v61 }
 0xcf6   :  { %3501 = vmatpush3.msra.mxu1 %v1473_v61 }
 0xcf7   :  { %3502 = vmatprep.subr.mxu1 %v1472_v62 }
 0xcf8   :  { %3503 = vmatpush3.msra.mxu1 %v1472_v62 }
 0xcf9   :  { %3504 = vmatprep.subr.mxu1 %v1471_v63 }
 0xcfa   :  { %3505 = vmatpush3.msra.mxu1 %v1471_v63  ;;  %v3165_v63 = vld [vmem:[%s4747_s24 + $0x1] ss:$0 sm:$0xff]  ;;  %s4757_s24 = smov 24  }
 0xcfb   :  { %3506 = vmatprep.subr.mxu1 %v1470_v0 }
 0xcfc   :  { %3507 = vmatpush3.msra.mxu1 %v1470_v0 }
 0xcfd   :  { %3508 = vmatprep.subr.mxu1 %v1469_v3 }
 0xcfe   :  { %3509 = vmatpush3.msra.mxu1 %v1469_v3 }
 0xcff   :  { %3510 = vmatprep.subr.mxu1 %v1468_v4 }
 0xd00   :  { %3511 = vmatpush3.msra.mxu1 %v1468_v4 }
 0xda1   :  { %v3468_v8 = vpop.f32.mrf.mxu1 }
 0xda2   :  { %v1300_v18 = vadd.f32 %v3468_v8, %v4062_v7 }
 0xda3   :  { %v1290_v9 = vpop.f32.mrf.mxu1 }
 0xda4   :  { %v4261_v10 = vadd.f32 %v3156_v19, %v1300_v18  ;;  %v1299_v11 = vadd.f32 %v1290_v9, %v4056_v2 }
 0xda6   :  { %v4264_v12 = vadd.f32 %v3156_v19, %v1299_v11  ;;  %v1315_v13 = vsel %vm190_vm2, %v4261_v10, 0.0  ;;  %v1319_v16 = vmul.f32 %v4261_v10, %v4261_v10 }
 0xda7   :  { %1316 = vadd.xlane.f32.xlu1 %v1315_v13 }
 0xda8   :  { %v1312_v14 = vsel %vm186_vm1, %v4264_v12, 0.0  ;;  %v1318_v15 = vmul.f32 %v4264_v12, %v4264_v12  ;;  %v1323_v2 = vsel %vm190_vm2, %v1319_v16, 0.0 }
 0xda9   :  { %1313 = vadd.xlane.f32.xlu0 %v1312_v14 }
 0xdaa   :  { %v1320_v7 = vsel %vm186_vm1, %v1318_v15, 0.0 }
 0xdad   :  { %1321 = vadd.xlane.f32.xlu0 %v1320_v7 }
 0xdb1   :  { %1324 = vadd.xlane.f32.xlu0 %v1323_v2 }
 0xe30   :  { %v1317_v25 = vpop.xlane.xlu1 %1316 }
 0xe31   :  { %v1327_v27 = vmul.f32 0.03125, %v1317_v25 }
 0xe32   :  { %v1314_v23 = vpop.xlane.xlu0 %1313 }
 0xe33   :  { %v1326_v24 = vmul.f32 0.03125, %v1314_v23  ;;  %v1331_v32 = vmul.f32 %v1327_v27, %v1327_v27  ;;  %v1335_v41 = vsub.f32 %v4261_v10, %v1327_v27 }
 0xe35   :  { %v1330_v28 = vmul.f32 %v1326_v24, %v1326_v24  ;;  %v1334_v37 = vsub.f32 %v4264_v12, %v1326_v24 }
 0xe36   :  { %v1322_v26 = vpop.xlane.xlu0 %1321 }
 0xe37   :  { %v1328_v29 = vmul.f32 0.03125, %v1322_v26 }
 0xe39   :  { %v1332_v30 = vsub.f32 %v1328_v29, %v1330_v28  ;;  %v3162_v29 = vld [vmem:[%s4706_s17] ss:$0 sm:$0xff] }
 0xe3a   :  { %v1325_v31 = vpop.xlane.xlu0 %1324 }
 0xe3b   :  { %v1336_v33 = vadd.f32 1e-05, %v1332_v30  ;;  %v1329_v34 = vmul.f32 0.03125, %v1325_v31 }
 0xe3d   :  { %3718 = vrsqrt.f32 %v1336_v33  ;;  %v1333_v35 = vsub.f32 %v1329_v34, %v1331_v32 }
 0xe3f   :  { %v1337_v36 = vadd.f32 1e-05, %v1333_v35 }
 0xe41   :  { %3720 = vrsqrt.f32 %v1337_v36 }
 0xe4a   :  { %v3719_v46 = vpop.eup %3718 }
 0xe4b   :  { %v1340_v39 = vmul.f32 %v3719_v46, %v1334_v37 }
 0xe4d   :  { %v1348_v42 = vmul.f32 %v3157_v38, %v1340_v39  ;;  %v3170_v39 = vld [vmem:[%s4697_s8 + $0x38] sm:$0xff] }
 0xe4e   :  { %v3721_v43 = vpop.eup %3720  ;;  %3515 = vmatprep.subr.mxu0 %v3170_v39 }
 0xe4f   :  { %v1341_v45 = vmul.f32 %v3721_v43, %v1335_v41  ;;  %v1356_v47 = vadd.f32 %v3158_v40, %v1348_v42  ;;  %v3168_v41 = vld [vmem:[%s4697_s8 + $0x28] sm:$0xff]  ;;  %v3167_v42 = vld [vmem:[%s4697_s8 + $0x20] sm:$0xff] }
 0xe51   :  { %v1349_v48 = vmul.f32 %v3157_v38, %v1341_v45  ;;  %3477 = vmatprep.mubr.msk.f32.mxu0 %vm186_vm1, %v1356_v47 }
 0xe53   :  { %v1357_v50 = vadd.f32 %v3158_v40, %v1349_v48  ;;  %v3169_v40 = vld [vmem:[%s4697_s8 + $0x30] sm:$0xff] }
 0xe55   :  { %3478 = vmatmul.mubr.msk.f32.vlgmr.msra.gmra.mxu0 %vm186_vm1, %v1357_v50 }
 0xe56   :  { %3516 = vmatpush3.msra.mxu0 %v3170_v39 }
 0xe57   :  { %3517 = vmatprep.subr.mxu0 %v3169_v40 }
 0xe58   :  { %3518 = vmatpush3.msra.mxu0 %v3169_v40 }
 0xe59   :  { %3519 = vmatprep.subr.mxu0 %v3168_v41 }
 0xe5a   :  { %3520 = vmatpush3.msra.mxu0 %v3168_v41 }
 0xe5b   :  { %3521 = vmatprep.subr.mxu0 %v3167_v42 }
 0xe5c   :  { %3522 = vmatpush3.msra.mxu0 %v3167_v42 }
 0xf15   :  { %v3479_v6 = vpop.f32.mrf.mxu0 }
 0xf16   :  { %v1447_v8 = vadd.f32 %v3479_v6, %v3159_v5  ;;  %v3166_v6 = vld [vmem:[%s4696_s7 + $0x1] ss:$0 sm:$0xff]  ;;  %s4749_s7 = smov 112  }
 0xf17   :  { %v1441_v19 = vpop.f32.mrf.mxu0 }
 0xf18   :  { %v1451_v18 = vmul.f32 %v1447_v8, %v1447_v8  ;;  %v1442_v9 = vadd.f32 %v3159_v5, %v1441_v19 }
 0xf1a   :  { %v1453_v11 = vmul.f32 %v1451_v18, %v1447_v8  ;;  %v1450_v13 = vmul.f32 %v1442_v9, %v1442_v9 }
 0xf1c   :  { %v1455_v14 = vmul.f32 0.044715, %v1453_v11  ;;  %v1452_v15 = vmul.f32 %v1450_v13, %v1442_v9 }
 0xf1e   :  { %v1457_v7 = vadd.f32 %v1455_v14, %v1447_v8  ;;  %v1454_v16 = vmul.f32 0.044715, %v1452_v15 }
 0xf20   :  { %v1459_v2 = vmul.f32 0.7978846, %v1457_v7  ;;  %v1456_v17 = vadd.f32 %v1454_v16, %v1442_v9 }
 0xf22   :  { %3722 = vtanh.f32 %v1459_v2  ;;  %v1458_v20 = vmul.f32 0.7978846, %v1456_v17 }
 0xf24   :  { %3724 = vtanh.f32 %v1458_v20 }
 0xf2f   :  { %v3723_v21 = vpop.eup %3722 }
 0xf30   :  { %v1463_v22 = vadd.f32 1.0, %v3723_v21 }
 0xf31   :  { %v3725_v23 = vpop.eup %3724 }
 0xf32   :  { %v1462_v24 = vadd.f32 1.0, %v3725_v23  ;;  %v1465_v25 = vmul.f32 0.5, %v1463_v22 }
 0xf34   :  { %v1464_v26 = vmul.f32 0.5, %v1462_v24  ;;  %v1467_v28 = vmul.f32 %v1465_v25, %v1447_v8 }
 0xf36   :  { %v1466_v27 = vmul.f32 %v1464_v26, %v1442_v9  ;;  %v3172_v9 = vld [vmem:[%s4698_s9 + $0x1] ss:$0 sm:$0xff] }
 0xf38   :  { %3512 = vmatprep.mubr.f32.mxu1 %v1466_v27 }
 0xf39   :  { %3513 = vmatmul.mubr.f32.vlgmr.msra.gmra.mxu1 %v1467_v28 }
 0xff9   :  { %v3514_v30 = vpop.f32.mrf.mxu1 }
 0xffa   :  { %v1563_v31 = vadd.f32 %v3514_v30, %v3162_v29 }
 0xffb   :  { %v1557_v32 = vpop.f32.mrf.mxu1 }
 0xffc   :  { %v4353_v33 = vadd.f32 %v1563_v31, %v4261_v10  ;;  %v1558_v34 = vadd.f32 %v3162_v29, %v1557_v32 }
 0xffe   :  { %v4356_v35 = vadd.f32 %v1558_v34, %v4264_v12  ;;  %v1575_v36 = vsel %vm190_vm2, %v4353_v33, 0.0  ;;  %v1579_v37 = vmul.f32 %v4353_v33, %v4353_v33 }
 0xfff   :  { %1576 = vadd.xlane.f32.xlu1 %v1575_v36 }
0x1000   :  { %v1572_v46 = vsel %vm186_vm1, %v4356_v35, 0.0  ;;  %v1578_v38 = vmul.f32 %v4356_v35, %v4356_v35  ;;  %v1583_v10 = vsel %vm190_vm2, %v1579_v37, 0.0 }
0x1001   :  { %1573 = vadd.xlane.f32.xlu0 %v1572_v46 }
0x1002   :  { %v1580_v12 = vsel %vm186_vm1, %v1578_v38, 0.0 }
0x1003   :  { %1584 = vadd.xlane.f32.xlu1 %v1583_v10 }
0x1005   :  { %1581 = vadd.xlane.f32.xlu0 %v1580_v12 }
0x1088   :  { %v1577_v43 = vpop.xlane.xlu1 %1576 }
0x1089   :  { %v1587_v45 = vmul.f32 0.03125, %v1577_v43 }
0x108a   :  { %v1574_v47 = vpop.xlane.xlu0 %1573 }
0x108b   :  { %v1586_v48 = vmul.f32 0.03125, %v1574_v47  ;;  %v1591_v44 = vmul.f32 %v1587_v45, %v1587_v45  ;;  %v1595_v60 = vsub.f32 %v4353_v33, %v1587_v45 }
0x108c   :  { %v1585_v50 = vpop.xlane.xlu1 %1584 }
0x108d   :  { %v1589_v52 = vmul.f32 0.03125, %v1585_v50  ;;  %v1590_v54 = vmul.f32 %v1586_v48, %v1586_v48  ;;  %v1594_v62 = vsub.f32 %v4356_v35, %v1586_v48 }
0x108e   :  { %v1582_v53 = vpop.xlane.xlu0 %1581 }
0x108f   :  { %v1593_v55 = vsub.f32 %v1589_v52, %v1591_v44  ;;  %v1588_v56 = vmul.f32 0.03125, %v1582_v53 }
0x1091   :  { %v1597_v57 = vadd.f32 1e-05, %v1593_v55  ;;  %v1592_v58 = vsub.f32 %v1588_v56, %v1590_v54  ;;  %v4458_v54 = vld [vmem:[%s4748_s4 + $0x8] sm:$0x3] }
0x1093   :  { %3726 = vrsqrt.f32 %v1597_v57  ;;  %v1596_v59 = vadd.f32 1e-05, %v1592_v58  ;;  %v4464_v58 = vld [vmem:[%s4748_s4] sm:$0xff]  ;;  %s4750_s4 = smov 56  }
0x1095   :  { %3728 = vrsqrt.f32 %v1596_v59 }
0x10a0   :  { %v3727_v61 = vpop.eup %3726 }
0x10a1   :  { %v1601_v0 = vmul.f32 %v3727_v61, %v1595_v60 }
0x10a2   :  { %v3729_v3 = vpop.eup %3728 }
0x10a3   :  { %v1600_v4 = vmul.f32 %v3729_v3, %v1594_v62  ;;  %v1609_v5 = vmul.f32 %v3165_v63, %v1601_v0 }
0x10a5   :  { %v1608_v8 = vmul.f32 %v3165_v63, %v1600_v4  ;;  %v1617_v18 = vadd.f32 %v3166_v6, %v1609_v5 }
0x10a7   :  { %v1616_v19 = vadd.f32 %v3166_v6, %v1608_v8 }
0x10a9   :  { %3523 = vmatprep.mubr.msk.f32.mxu0 %vm186_vm1, %v1616_v19 }
0x10aa   :  { %3524 = vmatmul.mubr.msk.f32.vlgmr.msra.gmra.mxu0 %vm186_vm1, %v1617_v18 }
0x116a   :  { %v3525_v11 = vpop.f32.mrf.mxu0 }
0x116b   :  { %v4393_v13 = vadd.f32 %v3525_v11, %v3172_v9 }
0x116c   :  { %v1703_v14 = vpop.f32.mrf.mxu0 }
0x116d   :  { %v4395_v15 = vadd.f32 %v3172_v9, %v1703_v14  ;;  %1716 = vrot.lane.b32.xlu0 %v4393_v13, %s3799_s3 }
0x116f   :  { %1714 = vrot.lane.b32.xlu1 %v4395_v15, %s3799_s3  ;;  %3530 = vmatprep.mubr.msk.f32.mxu0 %vm382_vm3, %v4395_v15 }
0x11df   :  { %v1717_v7 = vpop.permute.xlu0 %1716 }
0x11e0   :  { %3526 = vmatprep.subr.msk.mxu0 %vm382_vm3, %v1717_v7 }
0x11e1   :  { %3527 = vmatpush3.xpose.msk.msra.mxu0 %vm382_vm3, %v1717_v7  ;;  %v1715_v16 = vpop.permute.xlu1 %1714 }
0x11e2   :  { %3528 = vmatprep.subr.msk.mxu0 %vm382_vm3, %v1715_v16 }
0x11e5   :  { %3529 = vmatpush3.xpose.msk.msra.mxu0 %vm382_vm3, %v1715_v16 }
0x11e8   :  { %3531 = vmatmul.mubr.msk.f32.vlgmr.msra.gmra.mxu0 %vm382_vm3, %v4393_v13 }
0x12a8   :  { %v3532_v2 = vpop.f32.mrf.mxu0 }
0x12a9   :  { %v1798_v17 = vadd.f32 %v3532_v2, %v4114_v49 }
0x12aa   :  { %v1792_v20 = vpop.f32.mrf.mxu0 }
0x12ab   :  { %v1793_v21 = vadd.f32 %v1792_v20, %v4119_v51  ;;  %v1804_v22 = vsel %vm470_vm4, %v1798_v17, -inf }
0x12ac   :  { %1805 = vmax.xlane.f32.xlu0 %v1804_v22 }
0x12ad   :  { %v1801_v23 = vsel %vm466_vm5, %v1793_v21, -inf }
0x12ae   :  { %1802 = vmax.xlane.f32.xlu1 %v1801_v23 }
0x12bf   :  { %1823 = vrot.lane.b32.xlu1 %v4395_v15, %s3800_s23 }
0x12c2   :  { %1825 = vrot.lane.b32.xlu0 %v4393_v13, %s3800_s23 }
0x12c3   :  { %1917 = vrot.lane.b32.xlu1 %v4393_v13, %s3801_s1 }
0x12c7   :  { %1915 = vrot.lane.b32.xlu1 %v4395_v15, %s3801_s1  ;;  %s4751_s1 = smov 48  }
0x1335   :  { %v1806_v49 = vpop.xlane.xlu0 %1805 }
0x1336   :  { %v1808_v51 = vsub.f32 %v1798_v17, %v1806_v49 }
0x1337   :  { %v1803_v24 = vpop.xlane.xlu1 %1802 }
0x1338   :  { %v1811_v25 = vmul.f32 1.442695, %v1808_v51  ;;  %v1807_v26 = vsub.f32 %v1793_v21, %v1803_v24 }
0x1339   :  { %v1826_v27 = vpop.permute.xlu0 %1825 }
0x133a   :  { %3730 = vpow2.f32 %v1811_v25  ;;  %v1809_v28 = vmul.f32 1.442695, %v1807_v26  ;;  %3533 = vmatprep.subr.msk.mxu0 %vm501_vm6, %v1826_v27 }
0x133b   :  { %3534 = vmatpush3.msk.msra.mxu0 %vm501_vm6, %v1826_v27  ;;  %v1824_v29 = vpop.permute.xlu1 %1823 }
0x133c   :  { %3732 = vpow2.f32 %v1809_v28  ;;  %3535 = vmatprep.subr.mxu0 %v1824_v29 }
0x133d   :  { %3536 = vmatpush3.msra.mxu0 %v1824_v29 }
0x133f   :  { %v1918_v30 = vpop.permute.xlu1 %1917 }
0x1340   :  { %3540 = vmatprep.subr.msk.mxu0 %vm382_vm3, %v1918_v30 }
0x1343   :  { %v1916_v37 = vpop.permute.xlu1 %1915 }
0x1347   :  { %v3731_v31 = vpop.eup %3730 }
0x1348   :  { %v1816_v32 = vsel %vm470_vm4, %v3731_v31, 0.0 }
0x1349   :  { %v3733_v34 = vpop.eup %3732  ;;  %1817 = vadd.xlane.f32.xlu1 %v1816_v32 }
0x134a   :  { %v1813_v36 = vsel %vm466_vm5, %v3733_v34, 0.0 }
0x134b   :  { %1814 = vadd.xlane.f32.xlu0 %v1813_v36 }
0x135a   :  { %1911 = vrot.lane.b32.xlu1 %v4395_v15, %s3802_s5 }
0x135e   :  { %2116 = vrot.lane.b32.xlu1 %v4395_v15, %s3804_s6 }
0x1361   :  { %2118 = vrot.lane.b32.xlu0 %v4393_v13, %s3804_s6  ;;  %s4753_s6 = smov 104  }
0x1362   :  { %2114 = vrot.lane.b32.xlu1 %v4393_v13, %s4749_s7 }
0x1365   :  { %1913 = vrot.lane.b32.xlu0 %v4393_v13, %s3802_s5  ;;  %s4752_s5 = smov 72  }
0x1369   :  { %2112 = vrot.lane.b32.xlu0 %v4395_v15, %s4749_s7 }
0x13d2   :  { %v1818_v46 = vpop.xlane.xlu1 %1817 }
0x13d3   :  { %3734 = vrcp.f32 %v1818_v46 }
0x13d4   :  { %v1815_v38 = vpop.xlane.xlu0 %1814 }
0x13d5   :  { %3736 = vrcp.f32 %v1815_v38 }
0x13d6   :  { %v1912_v10 = vpop.permute.xlu1 %1911 }
0x13d8   :  { %v2119_v12 = vpop.permute.xlu0 %2118 }
0x13d9   :  { %3554 = vmatprep.subr.msk.mxu1 %vm382_vm3, %v2119_v12 }
0x13da   :  { %3555 = vmatpush3.xpose.msk.msra.mxu1 %vm382_vm3, %v2119_v12  ;;  %v2117_v39 = vpop.permute.xlu1 %2116 }
0x13db   :  { %3556 = vmatprep.subr.msk.mxu1 %vm382_vm3, %v2117_v39 }
0x13dc   :  { %v1914_v40 = vpop.permute.xlu0 %1913 }
0x13de   :  { %3557 = vmatpush3.xpose.msk.msra.mxu1 %vm382_vm3, %v2117_v39  ;;  %v2115_v43 = vpop.permute.xlu1 %2114 }
0x13e0   :  { %v2113_v41 = vpop.permute.xlu0 %2112  ;;  %v3735_v42 = vpop.eup %3734 }
0x13e1   :  { %3558 = vmatprep.mubr.msk.f32.mxu1 %vm382_vm3, %v2113_v41  ;;  %v1822_v48 = vmul.f32 %v3735_v42, %v3731_v31 }
0x13e2   :  { %v3737_v45 = vpop.eup %3736  ;;  %3559 = vmatmul.mubr.msk.f32.vlgmr.msra.gmra.mxu1 %vm382_vm3, %v2115_v43 }
0x13e3   :  { %v1821_v47 = vmul.f32 %v3737_v45, %v3733_v34 }
0x13e5   :  { %3537 = vmatprep.mubr.msk.f32.mxu0 %vm466_vm5, %v1821_v47 }
0x13e6   :  { %3538 = vmatmul.mubr.msk.f32.vlgmr.msra.gmra.mxu0 %vm466_vm5, %v1822_v48 }
0x13e7   :  { %3541 = vmatpush3.xpose.msk.msra.mxu0 %vm382_vm3, %v1918_v30  ;;  %3544 = vmatprep.mubr.msk.f32.mxu0 %vm382_vm3, %v1912_v10 }
0x13e8   :  { %3542 = vmatprep.subr.msk.mxu0 %vm382_vm3, %v1916_v37 }
0x13eb   :  { %3543 = vmatpush3.xpose.msk.msra.mxu0 %vm382_vm3, %v1916_v37 }
0x13ee   :  { %3545 = vmatmul.mubr.msk.f32.vlgmr.msra.gmra.mxu0 %vm382_vm3, %v1914_v40 }
0x14a2   :  { %v3560_v44 = vpop.f32.mrf.mxu1 }
0x14a3   :  { %v2200_v63 = vadd.f32 %v4458_v54, %v3560_v44 }
0x14a4   :  { %v2194_v56 = vpop.f32.mrf.mxu1 }
0x14a5   :  { %v2195_v61 = vadd.f32 %v4464_v58, %v2194_v56  ;;  %v2206_v3 = vsel %vm470_vm4, %v2200_v63, -inf }
0x14a6   :  { %v4451_v50 = vpop.f32.mrf.mxu0 }
0x14a7   :  { %v2203_v0 = vsel %vm466_vm5, %v2195_v61, -inf }
0x14a8   :  { %v4453_v52 = vpop.f32.mrf.mxu0 }
0x14ae   :  { %v3546_v53 = vpop.f32.mrf.mxu0 }
0x14af   :  { %v1999_v55 = vadd.f32 %v4458_v54, %v3546_v53 }
0x14b0   :  { %v1993_v57 = vpop.f32.mrf.mxu0 }
0x14b1   :  { %v1994_v59 = vadd.f32 %v4464_v58, %v1993_v57  ;;  %v2005_v60 = vsel %vm470_vm4, %v1999_v55, -inf }
0x14b2   :  { %2006 = vmax.xlane.f32.xlu1 %v2005_v60 }
0x14b3   :  { %v2002_v62 = vsel %vm466_vm5, %v1994_v59, -inf }
0x14b4   :  { %2003 = vmax.xlane.f32.xlu0 %v2002_v62 }
0x14b8   :  { %2204 = vmax.xlane.f32.xlu0 %v2203_v0 }
0x14bc   :  { %2207 = vmax.xlane.f32.xlu0 %v2206_v3 }
0x153b   :  { %v2007_v6 = vpop.xlane.xlu1 %2006 }
0x153c   :  { %v2009_v18 = vsub.f32 %v1999_v55, %v2007_v6 }
0x153d   :  { %v2004_v4 = vpop.xlane.xlu0 %2003 }
0x153e   :  { %v2008_v5 = vsub.f32 %v1994_v59, %v2004_v4  ;;  %v2012_v16 = vmul.f32 1.442695, %v2009_v18 }
0x1540   :  { %v2010_v9 = vmul.f32 1.442695, %v2008_v5 }
0x1541   :  { %v2205_v8 = vpop.xlane.xlu0 %2204 }
0x1542   :  { %v2209_v19 = vsub.f32 %v2195_v61, %v2205_v8 }
0x1544   :  { %v2211_v11 = vmul.f32 1.442695, %v2209_v19 }
0x1545   :  { %v2208_v14 = vpop.xlane.xlu0 %2207 }
0x1546   :  { %3738 = vpow2.f32 %v2211_v11  ;;  %v2210_v7 = vsub.f32 %v2200_v63, %v2208_v14 }
0x1547   :  { %3740 = vpow2.f32 %v2010_v9 }
0x1548   :  { %v2213_v2 = vmul.f32 1.442695, %v2210_v7 }
0x154a   :  { %3742 = vpow2.f32 %v2213_v2  ;;  %v3204_v2 = vld [vmem:[%s4699_s10 + $0x28] sm:$0xff] }
0x154b   :  { %3744 = vpow2.f32 %v2012_v16  ;;  %v3205_v16 = vld [vmem:[%s4699_s10 + $0x30] sm:$0xff] }
0x1553   :  { %v3739_v17 = vpop.eup %3738 }
0x1554   :  { %v2215_v20 = vsel %vm466_vm5, %v3739_v17, 0.0  ;;  %v3741_v21 = vpop.eup %3740 }
0x1555   :  { %2216 = vadd.xlane.f32.xlu0 %v2215_v20  ;;  %v2014_v23 = vsel %vm466_vm5, %v3741_v21, 0.0 }
0x1557   :  { %v3743_v22 = vpop.eup %3742 }
0x1558   :  { %v2218_v49 = vsel %vm470_vm4, %v3743_v22, 0.0  ;;  %v3745_v51 = vpop.eup %3744 }
0x1559   :  { %2015 = vadd.xlane.f32.xlu0 %v2014_v23  ;;  %2219 = vadd.xlane.f32.xlu1 %v2218_v49  ;;  %v2017_v24 = vsel %vm470_vm4, %v3745_v51, 0.0 }
0x155d   :  { %2018 = vadd.xlane.f32.xlu1 %v2017_v24 }
0x156e   :  { %2024 = vrot.lane.b32.xlu1 %v4395_v15, %s4750_s4 }
0x156f   :  { %2026 = vrot.lane.b32.xlu0 %v4393_v13, %s4750_s4 }
0x1572   :  { %2227 = vrot.lane.b32.xlu1 %v4393_v13, %s4751_s1 }
0x1573   :  { %2319 = vrot.lane.b32.xlu0 %v4393_v13, %s4752_s5 }
0x1576   :  { %2225 = vrot.lane.b32.xlu1 %v4395_v15, %s4751_s1 }
0x1577   :  { %2313 = vrot.lane.b32.xlu0 %v4395_v15, %s4753_s6 }
0x157a   :  { %2317 = vrot.lane.b32.xlu1 %v4395_v15, %s4752_s5 }
0x157e   :  { %2315 = vrot.lane.b32.xlu1 %v4393_v13, %s4753_s6 }
0x15de   :  { %v2217_v25 = vpop.xlane.xlu0 %2216 }
0x15e2   :  { %v2016_v26 = vpop.xlane.xlu0 %2015  ;;  %v2220_v27 = vpop.xlane.xlu1 %2219 }
0x15e3   :  { %3746 = vrcp.f32 %v2016_v26 }
0x15e4   :  { %3748 = vrcp.f32 %v2217_v25 }
0x15e6   :  { %v2027_v28 = vpop.permute.xlu0 %2026  ;;  %v2019_v29 = vpop.xlane.xlu1 %2018 }
0x15e7   :  { %3750 = vrcp.f32 %v2019_v29  ;;  %3547 = vmatprep.subr.msk.mxu0 %vm501_vm6, %v2027_v28 }
0x15e8   :  { %3548 = vmatpush3.msk.msra.mxu0 %vm501_vm6, %v2027_v28  ;;  %3752 = vrcp.f32 %v2220_v27 }
0x15ea   :  { %v2025_v30 = vpop.permute.xlu1 %2024  ;;  %v2320_v46 = vpop.permute.xlu0 %2319 }
0x15eb   :  { %3549 = vmatprep.subr.mxu0 %v2025_v30 }
0x15ec   :  { %3550 = vmatpush3.msra.mxu0 %v2025_v30 }
0x15ee   :  { %v2228_v31 = vpop.permute.xlu1 %2227  ;;  %v2314_v41 = vpop.permute.xlu0 %2313 }
0x15ef   :  { %3561 = vmatprep.subr.msk.mxu0 %vm501_vm6, %v2228_v31 }
0x15f0   :  { %v3747_v32 = vpop.eup %3746 }
0x15f1   :  { %v2022_v34 = vmul.f32 %v3747_v32, %v3741_v21  ;;  %v3749_v36 = vpop.eup %3748 }
0x15f2   :  { %v2226_v12 = vpop.permute.xlu1 %2225  ;;  %v2223_v39 = vmul.f32 %v3749_v36, %v3739_v17  ;;  %v3203_v17 = vld [vmem:[%s4699_s10 + $0x20] sm:$0xff] }
0x15f3   :  { %3551 = vmatprep.mubr.msk.f32.mxu0 %vm466_vm5, %v2022_v34 }
0x15f4   :  { %v3751_v37 = vpop.eup %3750 }
0x15f5   :  { %v2023_v38 = vmul.f32 %v3751_v37, %v3745_v51  ;;  %v3753_v10 = vpop.eup %3752 }
0x15f6   :  { %v2224_v40 = vmul.f32 %v3753_v10, %v3743_v22  ;;  %v2318_v42 = vpop.permute.xlu1 %2317 }
0x15f7   :  { %3552 = vmatmul.mubr.msk.f32.vlgmr.msra.gmra.mxu0 %vm466_vm5, %v2023_v38 }
0x15f8   :  { %3562 = vmatpush3.msk.msra.mxu0 %vm501_vm6, %v2228_v31  ;;  %3565 = vmatprep.mubr.msk.f32.mxu0 %vm466_vm5, %v2223_v39 }
0x15f9   :  { %3563 = vmatprep.subr.mxu0 %v2226_v12 }
0x15fa   :  { %3564 = vmatpush3.msra.mxu0 %v2226_v12  ;;  %v2316_v43 = vpop.permute.xlu1 %2315 }
0x15fb   :  { %3568 = vmatprep.subr.msk.mxu0 %vm382_vm3, %v2320_v46  ;;  %3566 = vmatmul.mubr.msk.f32.vlgmr.msra.gmra.mxu0 %vm466_vm5, %v2224_v40 }
0x15fc   :  { %3569 = vmatpush3.xpose.msk.msra.mxu0 %vm382_vm3, %v2320_v46  ;;  %3572 = vmatprep.mubr.msk.f32.mxu0 %vm382_vm3, %v2314_v41  ;;  %v3217_v41 = vld [vmem:[%s4703_s14 + $0x30] sm:$0xff] }
0x15fd   :  { %3570 = vmatprep.subr.msk.mxu0 %vm382_vm3, %v2318_v42 }
0x1600   :  { %3571 = vmatpush3.xpose.msk.msra.mxu0 %vm382_vm3, %v2318_v42  ;;  %v3216_v42 = vld [vmem:[%s4703_s14 + $0x28] sm:$0xff] }
0x1603   :  { %3573 = vmatmul.mubr.msk.f32.vlgmr.msra.gmra.mxu0 %vm382_vm3, %v2316_v43  ;;  %v3215_v43 = vld [vmem:[%s4703_s14 + $0x20] sm:$0xff] }
0x16b7   :  { %v3553_v45 = vpop.f32.mrf.mxu0 }
0x16b9   :  { %v2103_v47 = vpop.f32.mrf.mxu0 }
0x16bb   :  { %v3567_v48 = vpop.f32.mrf.mxu0 }
0x16bd   :  { %v2304_v44 = vpop.f32.mrf.mxu0 }
0x16c3   :  { %v3574_v53 = vpop.f32.mrf.mxu0 }
0x16c4   :  { %v2401_v55 = vadd.f32 %v4458_v54, %v3574_v53 }
0x16c5   :  { %v2395_v56 = vpop.f32.mrf.mxu0 }
0x16c6   :  { %v2396_v57 = vadd.f32 %v4464_v58, %v2395_v56  ;;  %v2407_v59 = vsel %vm470_vm4, %v2401_v55, -inf }
0x16c7   :  { %2408 = vmax.xlane.f32.xlu1 %v2407_v59 }
0x16c8   :  { %v2404_v60 = vsel %vm466_vm5, %v2396_v57, -inf }
0x16c9   :  { %2405 = vmax.xlane.f32.xlu0 %v2404_v60 }
0x16d8   :  { %2426 = vrot.lane.b32.xlu1 %v4395_v15, %s4754_s0 }
0x16dc   :  { %2516 = vrot.lane.b32.xlu1 %v2103_v47, %s4755_s2 }
0x16e0   :  { %2518 = vrot.lane.b32.xlu1 %v3553_v45, %s4755_s2 }
0x16e4   :  { %2526 = vrot.lane.b32.xlu1 %v3567_v48, %s4756_s25 }
0x1750   :  { %v2409_v61 = vpop.xlane.xlu1 %2408 }
0x1751   :  { %v2411_v54 = vsub.f32 %v2401_v55, %v2409_v61 }
0x1752   :  { %v2406_v62 = vpop.xlane.xlu0 %2405 }
0x1753   :  { %v2414_v63 = vmul.f32 1.442695, %v2411_v54  ;;  %v2410_v58 = vsub.f32 %v2396_v57, %v2406_v62 }
0x1754   :  { %v2427_v18 = vpop.permute.xlu1 %2426 }
0x1755   :  { %3754 = vpow2.f32 %v2414_v63  ;;  %v2412_v0 = vmul.f32 1.442695, %v2410_v58 }
0x1757   :  { %3756 = vpow2.f32 %v2412_v0 }
0x1758   :  { %v2517_v22 = vpop.permute.xlu1 %2516 }
0x1759   :  { %v2538_v24 = vsel %vm382_vm3, %v4453_v52, %v2517_v22  ;;  %v3210_v52 = vld [vmem:[%s4700_s11 + $0x1] ss:$0 sm:$0xff]  ;;  %v3230_v22 = vld [vmem:[%s4705_s16 + $0xb8] sm:$0xff] }
0x175c   :  { %v2519_v23 = vpop.permute.xlu1 %2518 }
0x175d   :  { %v2539_v26 = vsel %vm382_vm3, %v4451_v50, %v2519_v23  ;;  %v3229_v23 = vld [vmem:[%s4705_s16 + $0xb0] sm:$0xff] }
0x1760   :  { %v2527_v49 = vpop.permute.xlu1 %2526 }
0x1761   :  { %v2541_v29 = vsel %vm1208_vm7, %v2539_v26, %v2527_v49  ;;  %v3228_v49 = vld [vmem:[%s4705_s16 + $0xa8] sm:$0xff] }
0x1762   :  { %v3755_v3 = vpop.eup %3754  ;;  %v3224_v26 = vld [vmem:[%s4705_s16 + $0x88] sm:$0xff] }
0x1763   :  { %v2419_v4 = vsel %vm470_vm4, %v3755_v3, 0.0 }
0x1764   :  { %v3757_v5 = vpop.eup %3756  ;;  %2420 = vadd.xlane.f32.xlu0 %v2419_v4 }
0x1765   :  { %v2416_v15 = vsel %vm466_vm5, %v3757_v5, 0.0 }
0x1768   :  { %2417 = vadd.xlane.f32.xlu0 %v2416_v15 }
0x177e   :  { %2428 = vrot.lane.b32.xlu0 %v4393_v13, %s4754_s0  ;;  %v3206_v13 = vld [vmem:[%s4699_s10 + $0x38] sm:$0xff] }
0x1782   :  { %2524 = vrot.lane.b32.xlu0 %v2304_v44, %s4756_s25 }
0x17ed   :  { %v2421_v6 = vpop.xlane.xlu0 %2420 }
0x17ee   :  { %3758 = vrcp.f32 %v2421_v6 }
0x17f1   :  { %v2418_v8 = vpop.xlane.xlu0 %2417 }
0x17f2   :  { %3760 = vrcp.f32 %v2418_v8 }
0x17f5   :  { %v2429_v19 = vpop.permute.xlu0 %2428 }
0x17f6   :  { %3575 = vmatprep.subr.msk.mxu1 %vm501_vm6, %v2429_v19 }
0x17f7   :  { %3576 = vmatpush3.msk.msra.mxu1 %vm501_vm6, %v2429_v19 }
0x17f8   :  { %3577 = vmatprep.subr.mxu1 %v2427_v18 }
0x17f9   :  { %3578 = vmatpush3.msra.mxu1 %v2427_v18  ;;  %v2525_v51 = vpop.permute.xlu0 %2524 }
0x17fa   :  { %3582 = vmatprep.subr.mxu1 %v3206_v13  ;;  %v2540_v27 = vsel %vm1208_vm7, %v2538_v24, %v2525_v51  ;;  %v3227_v51 = vld [vmem:[%s4705_s16 + $0xa0] sm:$0xff]  ;;  %v3226_v24 = vld [vmem:[%s4705_s16 + $0x98] sm:$0xff] }
0x17fb   :  { %v3759_v9 = vpop.eup %3758 }
0x17fc   :  { %v2425_v7 = vmul.f32 %v3759_v9, %v3755_v3  ;;  %v3213_v3 = vld [vmem:[%s4701_s12 + $0x1] ss:$0 sm:$0xff] }
0x17ff   :  { %v3761_v11 = vpop.eup %3760 }
0x1800   :  { %v2424_v14 = vmul.f32 %v3761_v11, %v3757_v5  ;;  %v3214_v5 = vld [vmem:[%s4702_s13 + $0x1] ss:$0 sm:$0xff]  ;;  %s3814_s13 = smov [#allocation2]  }
0x1801   :  { %s3109_s30 = sshll.u32 %s3814_s13, 4  ;;  %s3110_s30 = int_to_ptr.vmem [resolvable:$true] %s3109_s30 }
0x1802   :  { %3579 = vmatprep.mubr.msk.f32.mxu1 %vm466_vm5, %v2424_v14  ;;  %v3238_v14 = vld [vmem:[%s4705_s16 + $0xf8] sm:$0xff]  ;;  %s3776_s7 = scalar_lea.vmem %s3110_s30, 32  ;;  %p3781_p1 = scmp.lt.s32.totalorder %s3110_s30, %s3110_s30 }
0x1803   :  { %3580 = vmatmul.mubr.msk.f32.vlgmr.msra.gmra.mxu1 %vm466_vm5, %v2425_v7  ;;  %v3237_v7 = vld [vmem:[%s4705_s16 + $0xf0] sm:$0xff]  ;;  %p3777_p0 = scmp.ne.s32.totalorder %s3110_s30, %s3776_s7  ;;  %p3782_p2 = scmp.lt.s32.totalorder %s3776_s7, %s3776_s7 }
0x1804   :  { %3583 = vmatpush3.msra.mxu1 %v3206_v13  ;;  %v3236_v13 = vld [vmem:[%s4705_s16 + $0xe8] sm:$0xff] }
0x1805   :  { %3584 = vmatprep.subr.mxu1 %v3205_v16  ;;  %p3783_p3 = por %p3782_p2, %p3781_p1 }
0x1806   :  { %3585 = vmatpush3.msra.mxu1 %v3205_v16  ;;  %v3235_v16 = vld [vmem:[%s4705_s16 + $0xe0] sm:$0xff] }
0x1807   :  { %3586 = vmatprep.subr.mxu1 %v3204_v2  ;;  %p3784_p4 = pnand %p3783_p3, %p3777_p0 }
0x1808   :  { %3587 = vmatpush3.msra.mxu1 %v3204_v2  ;;  %v3234_v2 = vld [vmem:[%s4705_s16 + $0xd8] sm:$0xff] }
0x1809   :  { %3588 = vmatprep.subr.mxu1 %v3203_v17 }
0x180a   :  { %3589 = vmatpush3.msra.mxu1 %v3203_v17  ;;  %v3233_v17 = vld [vmem:[%s4705_s16 + $0xd0] sm:$0xff] }
0x180b   :  { %3604 = vmatprep.subr.mxu1 %v3238_v14 }
0x18c3   :  { %v3581_v20 = vpop.f32.mrf.mxu1 }
0x18c4   :  { %2534 = vrot.lane.b32.xlu1 %v3581_v20, %s4757_s24  ;;  %v3232_v20 = vld [vmem:[%s4705_s16 + $0xc8] sm:$0xff] }
0x18c5   :  { %v2505_v21 = vpop.f32.mrf.mxu1 }
0x18c6   :  { %2532 = vrot.lane.b32.xlu0 %v2505_v21, %s4757_s24  ;;  %v3231_v21 = vld [vmem:[%s4705_s16 + $0xc0] sm:$0xff] }
0x1936   :  { %v2535_v25 = vpop.permute.xlu1 %2534 }
0x1937   :  { %v2543_v31 = vsel %vm1211_vm8, %v2541_v29, %v2535_v25  ;;  %v3225_v25 = vld [vmem:[%s4705_s16 + $0x90] sm:$0xff] }
0x1938   :  { %v2533_v28 = vpop.permute.xlu0 %2532 }
0x1939   :  { %v2542_v30 = vsel %vm1211_vm8, %v2540_v27, %v2533_v28  ;;  %v3223_v27 = vld [vmem:[%s4705_s16 + $0x80] sm:$0xff] }
0x193a   :  { %3590 = vmatprep.mubr.msk.f32.mxu1 %vm186_vm1, %v2542_v30  ;;  %v3220_v28 = vld [vmem:[%s4704_s15 + $0x1] ss:$0 sm:$0xff] }
0x193b   :  { %3591 = vmatmul.mubr.msk.f32.vlgmr.msra.gmra.mxu1 %vm186_vm1, %v2543_v31 }
0x193c   :  { %3605 = vmatpush3.msra.mxu1 %v3238_v14 }
0x193d   :  { %3606 = vmatprep.subr.mxu1 %v3237_v7 }
0x193e   :  { %3607 = vmatpush3.msra.mxu1 %v3237_v7  ;;  %v3242_v7 = vld [vmem:[%s4708_s19] ss:$0 sm:$0xff] }
0x193f   :  { %3608 = vmatprep.subr.mxu1 %v3236_v13 }
0x1940   :  { %3609 = vmatpush3.msra.mxu1 %v3236_v13 }
0x1941   :  { %3610 = vmatprep.subr.mxu1 %v3235_v16 }
0x1942   :  { %3611 = vmatpush3.msra.mxu1 %v3235_v16 }
0x1943   :  { %3612 = vmatprep.subr.mxu1 %v3234_v2 }
0x1944   :  { %3613 = vmatpush3.msra.mxu1 %v3234_v2 }
0x1945   :  { %3614 = vmatprep.subr.mxu1 %v3233_v17 }
0x1946   :  { %3615 = vmatpush3.msra.mxu1 %v3233_v17 }
0x1947   :  { %3616 = vmatprep.subr.mxu1 %v3232_v20 }
0x1948   :  { %3617 = vmatpush3.msra.mxu1 %v3232_v20 }
0x1949   :  { %3618 = vmatprep.subr.mxu1 %v3231_v21 }
0x194a   :  { %3619 = vmatpush3.msra.mxu1 %v3231_v21 }
0x194b   :  { %3620 = vmatprep.subr.mxu1 %v3230_v22 }
0x194c   :  { %3621 = vmatpush3.msra.mxu1 %v3230_v22  ;;  %v3027_v22 = vld [vmem:[%s4710_s21 + $0x18] sm:$0xff] }
0x194d   :  { %3622 = vmatprep.subr.mxu1 %v3229_v23 }
0x194e   :  { %3623 = vmatpush3.msra.mxu1 %v3229_v23  ;;  %v3026_v23 = vld [vmem:[%s4710_s21 + $0x10] sm:$0xff] }
0x194f   :  { %3624 = vmatprep.subr.mxu1 %v3228_v49 }
0x1950   :  { %3625 = vmatpush3.msra.mxu1 %v3228_v49  ;;  %v3025_v49 = vld [vmem:[%s4710_s21 + $0x8] sm:$0xff] }
0x1951   :  { %3626 = vmatprep.subr.mxu1 %v3227_v51 }
0x1952   :  { %3627 = vmatpush3.msra.mxu1 %v3227_v51  ;;  %v3024_v51 = vld [vmem:[%s4710_s21] sm:$0xff] }
0x1953   :  { %3628 = vmatprep.subr.mxu1 %v3226_v24 }
0x1954   :  { %3629 = vmatpush3.msra.mxu1 %v3226_v24 }
0x1955   :  { %3630 = vmatprep.subr.mxu1 %v3225_v25 }
0x1956   :  { %3631 = vmatpush3.msra.mxu1 %v3225_v25 }
0x1957   :  { %3632 = vmatprep.subr.mxu1 %v3224_v26 }
0x1958   :  { %3633 = vmatpush3.msra.mxu1 %v3224_v26 }
0x1959   :  { %3634 = vmatprep.subr.mxu1 %v3223_v27 }
0x195a   :  { %3635 = vmatpush3.msra.mxu1 %v3223_v27 }
0x19fb   :  { %v3592_v32 = vpop.f32.mrf.mxu1 }
0x19fc   :  { %v2631_v50 = vadd.f32 %v3592_v32, %v4353_v33 }
0x19fd   :  { %v2621_v34 = vpop.f32.mrf.mxu1 }
0x19fe   :  { %v2641_v36 = vadd.f32 %v3210_v52, %v2631_v50  ;;  %v2630_v37 = vadd.f32 %v2621_v34, %v4356_v35  ;;  %v3218_v35 = vld [vmem:[%s4703_s14 + $0x38] sm:$0xff] }
0x19ff   :  { %3593 = vmatprep.subr.mxu0 %v3218_v35 }
0x1a00   :  { %v4554_v46 = vadd.f32 %v3210_v52, %v2630_v37  ;;  %v2649_v38 = vsel %vm190_vm2, %v2641_v36, 0.0  ;;  %v2653_v40 = vmul.f32 %v2641_v36, %v2641_v36  ;;  %3594 = vmatpush3.msra.mxu0 %v3218_v35 }
0x1a01   :  { %2650 = vadd.xlane.f32.xlu1 %v2649_v38  ;;  %3595 = vmatprep.subr.mxu0 %v3217_v41 }
0x1a02   :  { %v2646_v10 = vsel %vm186_vm1, %v4554_v46, 0.0  ;;  %v2652_v12 = vmul.f32 %v4554_v46, %v4554_v46  ;;  %v2657_v33 = vsel %vm190_vm2, %v2653_v40, 0.0  ;;  %3596 = vmatpush3.msra.mxu0 %v3217_v41 }
0x1a03   :  { %2647 = vadd.xlane.f32.xlu0 %v2646_v10  ;;  %3597 = vmatprep.subr.mxu0 %v3216_v42 }
0x1a04   :  { %v2654_v39 = vsel %vm186_vm1, %v2652_v12, 0.0  ;;  %3598 = vmatpush3.msra.mxu0 %v3216_v42 }
0x1a05   :  { %3599 = vmatprep.subr.mxu0 %v3215_v43 }
0x1a06   :  { %3600 = vmatpush3.msra.mxu0 %v3215_v43 }
0x1a07   :  { %2655 = vadd.xlane.f32.xlu0 %v2654_v39  ;;  %3639 = vmatprep.subr.mxu0 %v3798_v1 }
0x1a0b   :  { %2658 = vadd.xlane.f32.xlu0 %v2657_v33 }
0x1a8a   :  { %v2651_v48 = vpop.xlane.xlu1 %2650 }
0x1a8b   :  { %v2661_v53 = vmul.f32 0.03125, %v2651_v48 }
0x1a8c   :  { %v2648_v45 = vpop.xlane.xlu0 %2647 }
0x1a8d   :  { %v2660_v47 = vmul.f32 0.03125, %v2648_v45  ;;  %v2665_v60 = vmul.f32 %v2661_v53, %v2661_v53  ;;  %v2669_v15 = vsub.f32 %v2641_v36, %v2661_v53  ;;  %v3240_v53 = vld [vmem:[%s4706_s17 + $0x1] ss:$0 sm:$0xff] }
0x1a8f   :  { %v2664_v55 = vmul.f32 %v2660_v47, %v2660_v47  ;;  %v2668_v58 = vsub.f32 %v4554_v46, %v2660_v47 }
0x1a90   :  { %v2656_v44 = vpop.xlane.xlu0 %2655 }
0x1a91   :  { %v2662_v56 = vmul.f32 0.03125, %v2656_v44 }
0x1a93   :  { %v2666_v57 = vsub.f32 %v2662_v56, %v2664_v55 }
0x1a94   :  { %v2659_v59 = vpop.xlane.xlu0 %2658 }
0x1a95   :  { %v2670_v61 = vadd.f32 1e-05, %v2666_v57  ;;  %v2663_v54 = vmul.f32 0.03125, %v2659_v59 }
0x1a97   :  { %3762 = vrsqrt.f32 %v2670_v61  ;;  %v2667_v62 = vsub.f32 %v2663_v54, %v2665_v60 }
0x1a99   :  { %v2671_v63 = vadd.f32 1e-05, %v2667_v62 }
0x1a9b   :  { %3764 = vrsqrt.f32 %v2671_v63  ;;  %v2943_v63 = vld [vmem:[%s4709_s20 + $0x18] sm:$0xff] }
0x1aa4   :  { %v3763_v0 = vpop.eup %3762 }
0x1aa5   :  { %v2674_v4 = vmul.f32 %v3763_v0, %v2668_v58  ;;  %v2942_v58 = vld [vmem:[%s4709_s20 + $0x10] sm:$0xff]  ;;  %v2940_v0 = vld [vmem:[%s4709_s20] sm:$0xff] }
0x1aa7   :  { %v2682_v6 = vmul.f32 %v3213_v3, %v2674_v4 }
0x1aa8   :  { %v3765_v8 = vpop.eup %3764 }
0x1aa9   :  { %v2675_v19 = vmul.f32 %v3765_v8, %v2669_v15  ;;  %v2690_v18 = vadd.f32 %v3214_v5, %v2682_v6 }
0x1aab   :  { %v2683_v9 = vmul.f32 %v3213_v3, %v2675_v19  ;;  %3601 = vmatprep.mubr.msk.f32.mxu0 %vm186_vm1, %v2690_v18 }
0x1aad   :  { %v2691_v11 = vadd.f32 %v3214_v5, %v2683_v9 }
0x1aaf   :  { %3602 = vmatmul.mubr.msk.f32.vlgmr.msra.gmra.mxu0 %vm186_vm1, %v2691_v11  ;;  %v3241_v11 = vld [vmem:[%s4707_s18] ss:$0 sm:$0xff] }
0x1ab0   :  { %3640 = vmatpush3.msra.mxu0 %v2943_v63  ;;  %3647 = vmatprep.mubr.msk.f32.mxu0 %vm3813_vm10, %v3798_v1 }
0x1ab1   :  { %3641 = vmatprep.subr.mxu0 %v3798_v1 }
0x1ab2   :  { %3642 = vmatpush3.msra.mxu0 %v2942_v58 }
0x1ab3   :  { %3643 = vmatprep.subr.mxu0 %v3798_v1 }
0x1b6f   :  { %v3603_v29 = vpop.f32.mrf.mxu0 }
0x1b70   :  { %v2783_v30 = vadd.f32 %v3603_v29, %v3220_v28 }
0x1b71   :  { %v2777_v31 = vpop.f32.mrf.mxu0 }
0x1b72   :  { %v2787_v32 = vmul.f32 %v2783_v30, %v2783_v30  ;;  %v2778_v52 = vadd.f32 %v3220_v28, %v2777_v31 }
0x1b74   :  { %v2789_v50 = vmul.f32 %v2787_v32, %v2783_v30  ;;  %v2786_v34 = vmul.f32 %v2778_v52, %v2778_v52 }
0x1b76   :  { %v2791_v36 = vmul.f32 0.044715, %v2789_v50  ;;  %v2788_v37 = vmul.f32 %v2786_v34, %v2778_v52 }
0x1b78   :  { %v2793_v38 = vadd.f32 %v2791_v36, %v2783_v30  ;;  %v2790_v10 = vmul.f32 0.044715, %v2788_v37 }
0x1b7a   :  { %v2795_v12 = vmul.f32 0.7978846, %v2793_v38  ;;  %v2792_v39 = vadd.f32 %v2790_v10, %v2778_v52 }
0x1b7c   :  { %3766 = vtanh.f32 %v2795_v12  ;;  %v2794_v40 = vmul.f32 0.7978846, %v2792_v39 }
0x1b7e   :  { %3768 = vtanh.f32 %v2794_v40 }
0x1b89   :  { %v3767_v33 = vpop.eup %3766 }
0x1b8a   :  { %v2799_v35 = vadd.f32 1.0, %v3767_v33 }
0x1b8b   :  { %v3769_v41 = vpop.eup %3768 }
0x1b8c   :  { %v2798_v42 = vadd.f32 1.0, %v3769_v41  ;;  %v2801_v43 = vmul.f32 0.5, %v2799_v35 }
0x1b8e   :  { %v2800_v45 = vmul.f32 0.5, %v2798_v42  ;;  %v2803_v48 = vmul.f32 %v2801_v43, %v2783_v30 }
0x1b90   :  { %v2802_v47 = vmul.f32 %v2800_v45, %v2778_v52 }
0x1b92   :  { %3636 = vmatprep.mubr.f32.mxu1 %v2802_v47 }
0x1b93   :  { %3637 = vmatmul.mubr.f32.vlgmr.msra.gmra.mxu1 %v2803_v48 }
0x1c53   :  { %v3638_v44 = vpop.f32.mrf.mxu1 }
0x1c55   :  { %v2895_v55 = vpop.f32.mrf.mxu1 }
0x1c56   :  { %v2896_v56 = vadd.f32 %v3240_v53, %v2895_v55 }
0x1c58   :  { %v2903_v57 = vadd.f32 %v2896_v56, %v4554_v46  ;;  %v2941_v46 = vld [vmem:[%s4709_s20 + $0x8] sm:$0xff] }
0x1c59   :  { %3644 = vmatpush3.msra.mxu0 %v2941_v46 }
0x1c5a   :  { %v2905_v59 = vrot.slane %v2903_v57, 4  ;;  %3645 = vmatprep.subr.mxu0 %v3798_v1 }
0x1c5b   :  { %3646 = vmatpush3.msra.mxu0 %v2940_v0 }
0x1c5c   :  { %v2908_v60 = vsel %vm2907_vm9, %v2903_v57, %v2905_v59  ;;  %3650 = vmatprep.subr.mxu0 %v3798_v1 }
0x1c5d   :  { %v2911_v61 = vsel %vm190_vm2, %v2908_v60, 0.0  ;;  %v2914_v54 = vmul.f32 %v2908_v60, %v2908_v60 }
0x1c5e   :  { %2912 = vadd.xlane.f32.xlu0 %v2911_v61 }
0x1c5f   :  { %v2915_v62 = vsel %vm190_vm2, %v2914_v54, 0.0 }
0x1c60   :  { %2916 = vadd.xlane.f32.xlu1 %v2915_v62 }
0x1ce7   :  { %v2913_v3 = vpop.xlane.xlu0 %2912 }
0x1ce8   :  { %v2918_v4 = vmul.f32 0.03125, %v2913_v3 }
0x1ce9   :  { %v2917_v5 = vpop.xlane.xlu1 %2916 }
0x1cea   :  { %v2920_v15 = vmul.f32 %v2918_v4, %v2918_v4  ;;  %v2919_v6 = vmul.f32 0.03125, %v2917_v5  ;;  %v2922_v18 = vsub.f32 %v2908_v60, %v2918_v4 }
0x1cec   :  { %v2921_v8 = vsub.f32 %v2919_v6, %v2920_v15 }
0x1cee   :  { %v2923_v19 = vadd.f32 1e-05, %v2921_v8 }
0x1cf0   :  { %3770 = vrsqrt.f32 %v2923_v19 }
0x1cfd   :  { %v3771_v9 = vpop.eup %3770 }
0x1cfe   :  { %v2925_v14 = vmul.f32 %v3771_v9, %v2922_v18 }
0x1d00   :  { %v2932_v13 = vmul.f32 %v3241_v11, %v2925_v14 }
0x1d02   :  { %v2939_v16 = vadd.f32 %v3242_v7, %v2932_v13 }
0x1d04   :  { %3648 = vmatmul.mubr.msk.f32.vlgmr.msra.gmra.mxu0 %vm186_vm1, %v2939_v16 }
0x1d05   :  { %3658 = vmatprep.mubr.msk.f32.mxu0 %vm3813_vm10, %v3798_v1  ;;  %3651 = vmatpush3.msra.mxu0 %v3027_v22 }
0x1d06   :  { %3652 = vmatprep.subr.mxu0 %v3798_v1 }
0x1d07   :  { %3653 = vmatpush3.msra.mxu0 %v3026_v23 }
0x1d08   :  { %3654 = vmatprep.subr.mxu0 %v3798_v1 }
0x1d09   :  { %3655 = vmatpush3.msra.mxu0 %v3025_v49 }
0x1d0a   :  { %3656 = vmatprep.subr.mxu0 %v3798_v1 }
0x1d0b   :  { %3657 = vmatpush3.msra.mxu0 %v3024_v51 }
0x1dc4   :  { %v3013_v2 = vpop.f32.mrf.mxu0 }
0x1dc5   :  { %v3017_v17 = vmul.f32 %v3013_v2, %v3013_v2 }
0x1dc6   :  { %v3649_v20 = vpop.f32.mrf.mxu0 }
0x1dc7   :  { %v3018_v21 = vsel %vm190_vm2, %v3017_v17, 0.0 }
0x1dc8   :  { %3019 = vadd.xlane.f32.xlu0 %v3018_v21 }
0x1e51   :  { %v3020_v24 = vpop.xlane.xlu0 %3019 }
0x1e52   :  { %v3021_v25 = vadd.f32 1e-12, %v3020_v24 }
0x1e54   :  { %3772 = vrsqrt.f32 %v3021_v25 }
0x1e61   :  { %v3773_v26 = vpop.eup %3772 }
0x1e62   :  { %v3023_v27 = vmul.f32 %v3773_v26, %v3013_v2 }
0x1e64   :  { %3659 = vmatmul.mubr.msk.f32.vlgmr.msra.gmra.mxu0 %vm186_vm1, %v3023_v27 }
0x1f24   :  { %v3097_v28 = vpop.f32.mrf.mxu0 }
0x1f25   :  { %v3101_v29 = vmul.f32 100.0, %v3097_v28 }
0x1f26   :  { %v3660_v30 = vpop.f32.mrf.mxu0 }
0x1f27   :  { %3102 = vst [vmem:[#allocation2] sm:$0x3] %v3101_v29 }
0x1f28   :  { %3787 = shalt.err (!%p3784_p4)
}
0x1f29   :  { %3112 = dma.vmem_to_hbm [thread:$0]  %s3110_s30, 32, %s4711_s22, [#allocation3]  }
0x1f2a   :  { %3796 = dma.done.wait [#allocation3], 32  }
0x1f2b   :  { %3797 = vsyncadd [#allocation3], 4294967264 }
0x1f2c   :  { %3116 = vsyncpa [#allocation3], 1 }

</bundles_post_ra>
